<compile_context>
chip_gen: v7x
topology: tpu7x:2x2x1
jax: 0.10.0
libtpu: 0.0.40
codegen_flags: <defaults>
</compile_context>

<pallas_src>
import math
from functools import partial

import jax
import jax.numpy as jnp
from jax.experimental import pallas as pl
from jax.experimental.pallas import tpu as pltpu


# ---------------------------------------------------------------------------
# Tiling / compiler-parameter helpers
# ---------------------------------------------------------------------------
def _round_up(x, m):
    return (x + m - 1) // m * m


def _pad_tile(dim, max_tile):
    """Pad a lane dimension to a 128 multiple and pick a tile that divides it."""
    p = _round_up(dim, 128)
    if p <= max_tile:
        return p, p
    for t in range(max_tile - max_tile % 128, 127, -128):
        if p % t == 0:
            return p, t
    return p, 128


def _pad_tile_rows(dim, max_tile=512):
    """Pad a sublane (row) dimension to a multiple of 8 and pick a tile."""
    p = _round_up(dim, 8)
    if p <= max_tile:
        return p, p
    return _round_up(dim, max_tile), max_tile


_VMEM_LIMIT = None


def _compiler_params():
    """Per-generation VMEM budget: 3/4 of physical VMEM, capped at 96 MiB."""
    global _VMEM_LIMIT
    if _VMEM_LIMIT is None:
        try:
            cap = int(getattr(pltpu.get_tpu_info(), "vmem_capacity_bytes",
                              64 * 1024 * 1024))
        except Exception:
            cap = 64 * 1024 * 1024          # conservative (v7x-sized) default
        _VMEM_LIMIT = min(cap * 3 // 4, 96 * 1024 * 1024)
    return pltpu.CompilerParams(
        dimension_semantics=("parallel", "parallel", "arbitrary"),
        vmem_limit_bytes=_VMEM_LIMIT,
    )


# ---------------------------------------------------------------------------
# One-time weight preparation (pad + bf16 cast + fold bias/BN into scale/shift)
# ---------------------------------------------------------------------------
def _fold_bn(b, scale, shift, n):
    if scale is None:
        scale = jnp.ones((n,), jnp.float32)
    if shift is None:
        shift = jnp.zeros((n,), jnp.float32)
    scale = scale.astype(jnp.float32)
    shift_total = b.astype(jnp.float32) * scale + shift.astype(jnp.float32)
    return scale, shift_total


def _prep_matmul(w, b, scale=None, shift=None, *, max_tk=1024, max_tn=512):
    """w: (K, N) f32, b: (N,).  Padded bf16 weight + f32 scale/shift."""
    K, N = w.shape
    Kp, tk = _pad_tile(K, max_tk)
    Np, tn = _pad_tile(N, max_tn)
    sc, sh = _fold_bn(b, scale, shift, N)
    wp = jnp.pad(w.astype(jnp.bfloat16), ((0, Kp - K), (0, Np - N)))
    scp = jnp.pad(sc, (0, Np - N)).reshape(1, Np)
    shp = jnp.pad(sh, (0, Np - N)).reshape(1, Np)
    return dict(w=wp, scale=scp, shift=shp, k=K, n=N, tk=tk, tn=tn)


def _prep_conv3(w, b, scale=None, shift=None, *, max_tc=768):
    """w: (3, 3, Cin, Cout) f32, b: (Cout,)."""
    cin, cout = w.shape[2], w.shape[3]
    Cp, ck = _pad_tile(cin, max_tc)
    Np, cn = _pad_tile(cout, max_tc)
    sc, sh = _fold_bn(b, scale, shift, cout)
    wp = jnp.pad(w.reshape(9, cin, cout).astype(jnp.bfloat16),
                 ((0, 0), (0, Cp - cin), (0, Np - cout)))
    scp = jnp.pad(sc, (0, Np - cout)).reshape(1, Np)
    shp = jnp.pad(sh, (0, Np - cout)).reshape(1, Np)
    return dict(w=wp, scale=scp, shift=shp, cin=cin, cout=cout, ck=ck, cn=cn)


# ---------------------------------------------------------------------------
# Kernel 1: tiled fused matmul  out = maybe_relu((x @ w) * scale + shift)
# ---------------------------------------------------------------------------
def _matmul_kernel(x_ref, w_ref, sc_ref, sh_ref, o_ref, acc_ref, *, relu):
    k = pl.program_id(2)

    @pl.when(k == 0)
    def _init():
        acc_ref[...] = jnp.zeros_like(acc_ref)

    acc_ref[...] += jnp.dot(x_ref[...], w_ref[...],
                            preferred_element_type=jnp.float32)

    @pl.when(k == pl.num_programs(2) - 1)
    def _finalize():
        y = acc_ref[...] * sc_ref[...] + sh_ref[...]
        if relu:
            y = jnp.maximum(y, 0.0)
        o_ref[...] = y


def fused_matmul(x, prep, relu=False):
    """x: (M, K) f32 -> (M, n) f32, MXU runs in bf16 with f32 accumulation."""
    M, K = x.shape
    Kp, Np = prep['w'].shape
    tk, tn = prep['tk'], prep['tn']
    Mp, tm = _pad_tile_rows(M, 512)
    xp = jnp.pad(x.astype(jnp.bfloat16), ((0, Mp - M), (0, Kp - K)))
    out = pl.pallas_call(
        partial(_matmul_kernel, relu=relu),
        out_shape=jax.ShapeDtypeStruct((Mp, Np), jnp.float32),
        grid=(Mp // tm, Np // tn, Kp // tk),
        in_specs=[
            pl.BlockSpec((tm, tk), lambda i, j, k: (i, k)),
            pl.BlockSpec((tk, tn), lambda i, j, k: (k, j)),
            pl.BlockSpec((1, tn), lambda i, j, k: (0, j)),
            pl.BlockSpec((1, tn), lambda i, j, k: (0, j)),
        ],
        out_specs=pl.BlockSpec((tm, tn), lambda i, j, k: (i, j)),
        scratch_shapes=[pltpu.VMEM((tm, tn), jnp.float32)],
        compiler_params=_compiler_params(),
    )(xp, prep['w'], prep['scale'], prep['shift'])
    return out[:M, :prep['n']]


# ---------------------------------------------------------------------------
# Kernel 2: fused 3x3 "same" conv + BN + ReLU without HBM im2col.
#
# The activation is padded by (top=1, bottom=2, left=1, right=2), flattened to
# (B, (H+3)*(W+3), Cin).  For tap (dy, dx) the rows needed by ALL outputs form
# a single contiguous slice of that flat buffer starting at dy*(W+3)+dx, so the
# kernel accumulates 9 shifted-slice matmuls.  Output row h*(W+3)+w is the conv
# result at (h, w); the W..W+2 columns of each row are junk and sliced off.
# ---------------------------------------------------------------------------
def _conv3x3_kernel(x_ref, w_ref, sc_ref, sh_ref, o_ref, acc_ref, *,
                    Wr, Hx, relu):
    k = pl.program_id(2)

    @pl.when(k == 0)
    def _init():
        acc_ref[...] = jnp.zeros_like(acc_ref)

    for dy in range(3):
        for dx in range(3):
            a = x_ref[pl.ds(dy * Wr + dx, Hx), :]          # (Hx, ck) bf16
            acc_ref[...] += jnp.dot(a, w_ref[dy * 3 + dx],
                                    preferred_element_type=jnp.float32)

    @pl.when(k == pl.num_programs(2) - 1)
    def _finalize():
        y = acc_ref[...] * sc_ref[...] + sh_ref[...]
        if relu:
            y = jnp.maximum(y, 0.0)
        o_ref[...] = y


def conv3x3(x, prep, relu=False):
    """3x3 'same' conv (+ folded bias/BN + optional ReLU).  x: (B,H,W,Cin) f32."""
    B, H, W, C = x.shape
    Cp, Np = prep['w'].shape[1], prep['w'].shape[2]
    ck, cn = prep['ck'], prep['cn']
    Wr = W + 3                     # 1 left pad + 2 right pad (tap slack)
    Lp = (H + 3) * Wr              # 1 top pad + 2 bottom pad
    Hx = H * Wr                    # rows computed per image (cols W..W+2 junk)
    xp = jnp.pad(x.astype(jnp.bfloat16),
                 ((0, 0), (1, 2), (1, 2), (0, Cp - C)))
    xf = xp.reshape(B, Lp, Cp)
    out = pl.pallas_call(
        partial(_conv3x3_kernel, Wr=Wr, Hx=Hx, relu=relu),
        out_shape=jax.ShapeDtypeStruct((B, Hx, Np), jnp.float32),
        grid=(B, Np // cn, Cp // ck),
        in_specs=[
            pl.BlockSpec((None, Lp, ck), lambda b, j, k: (b, 0, k)),
            pl.BlockSpec((9, ck, cn), lambda b, j, k: (0, k, j)),
            pl.BlockSpec((1, cn), lambda b, j, k: (0, j)),
            pl.BlockSpec((1, cn), lambda b, j, k: (0, j)),
        ],
        out_specs=pl.BlockSpec((None, Hx, cn), lambda b, j, k: (b, 0, j)),
        scratch_shapes=[pltpu.VMEM((Hx, cn), jnp.float32)],
        compiler_params=_compiler_params(),
    )(xf, prep['w'], prep['scale'], prep['shift'])
    return out.reshape(B, H, Wr, Np)[:, :, :W, :prep['cout']]


# ---------------------------------------------------------------------------
# Thin wrappers (glue between Pallas kernels)
# ---------------------------------------------------------------------------
def conv1x1(x, prep, relu=False):
    B, H, W, C = x.shape
    y = fused_matmul(x.reshape(B * H * W, C), prep, relu=relu)
    return y.reshape(B, H, W, prep['n'])


def conv_transpose2x2(x, prep):
    """ConvTranspose2d(k=2, s=2) as a matmul to 4*Cout + pixel shuffle."""
    # TODO(synk): the 2x2 pixel shuffle is XLA glue; could be fused into the
    # matmul epilogue with a strided out_spec.
    B, H, W, C = x.shape
    cout = prep['n'] // 4
    y = fused_matmul(x.reshape(B * H * W, C), prep)
    y = y.reshape(B, H, W, 2, 2, cout).transpose(0, 1, 3, 2, 4, 5)
    return y.reshape(B, 2 * H, 2 * W, cout)


def maxpool2(x):
    # TODO(synk): could be fused into the producing conv kernel's epilogue.
    B, H, W, C = x.shape
    return x.reshape(B, H // 2, 2, W // 2, 2, C).max(axis=(2, 4))


def eca(x, w1d):
    """ECALayer: global-avg-pool -> 5-tap Conv1d over channels -> sigmoid gate."""
    # TODO(synk): gate stays in plain JAX (O(B*C) at the 1x1 bottleneck).
    B, H, W, C = x.shape
    y = x.mean(axis=(1, 2))                              # (B, C)
    k = w1d.shape[0]
    p = (k - 1) // 2
    yp = jnp.pad(y, ((0, 0), (p, p)))
    conv = sum(w1d[i] * yp[:, i:i + C] for i in range(k))
    g = jax.nn.sigmoid(conv)
    return x * g[:, None, None, :]


# ---------------------------------------------------------------------------
# Deterministic synthetic parameters (PyTorch module shapes), prepped once.
# ---------------------------------------------------------------------------
def init_params(key, num_classes):
    keys = iter(jax.random.split(key, 128))

    def _u(shape, bound):
        return jax.random.uniform(next(keys), shape, jnp.float32, -bound, bound)

    def bn(c):
        gamma = jax.random.uniform(next(keys), (c,), jnp.float32, 0.5, 1.5)
        beta = jax.random.normal(next(keys), (c,)) * 0.1
        mean = jax.random.normal(next(keys), (c,)) * 0.1
        var = jax.random.uniform(next(keys), (c,), jnp.float32, 0.5, 1.5)
        s = gamma / jnp.sqrt(var + 1e-5)
        return s, beta - mean * s

    def conv3_raw(cin, cout):
        bound = 1.0 / math.sqrt(cin * 9)
        return _u((3, 3, cin, cout), bound), _u((cout,), bound)

    def conv3(cin, cout, with_bn=False):
        w, b = conv3_raw(cin, cout)
        sc, sh = bn(cout) if with_bn else (None, None)
        return _prep_conv3(w, b, sc, sh)

    def conv3_reused(cin, cout):
        # One Conv2d applied twice; BN+ReLU only after the second application.
        w, b = conv3_raw(cin, cout)
        sc, sh = bn(cout)
        return _prep_conv3(w, b), _prep_conv3(w, b, sc, sh)

    def conv1(cin, cout):
        bound = 1.0 / math.sqrt(cin)
        return _prep_matmul(_u((cin, cout), bound), _u((cout,), bound))

    def convT(cin, cout):
        bound = 1.0 / math.sqrt(cin * 4)
        w = _u((cin, 2, 2, cout), bound)                 # (Cin, kH, kW, Cout)
        b = _u((cout,), bound)
        return _prep_matmul(w.reshape(cin, 4 * cout), jnp.tile(b, 4))

    p = {}
    p['conv11'] = conv3(3, 64)
    p['conv12'] = conv3(64, 64, with_bn=True)            # + bn1
    p['conv22'] = conv3(64, 128)
    p['conv222'] = conv3(128, 128, with_bn=True)         # + bn2
    p['conv33'] = conv3(128, 256)
    p['conv333'] = conv3(256, 256, with_bn=True)         # + bn3
    p['conv44'] = conv3(256, 512)
    p['conv444'] = conv3(512, 512, with_bn=True)         # + bn4
    p['upconv41'] = conv1(512, 1240)
    p['eca4'] = jax.random.normal(next(keys), (5,)) * 0.3   # Conv1d(1,1,5,no bias)
    p['upconv4'] = convT(1240, 546)
    p['convup4_a'], p['convup4_b'] = conv3_reused(546, 546)  # + upbn4
    p['upconv3'] = convT(802, 182)
    p['convup3_a'], p['convup3_b'] = conv3_reused(182, 182)  # + upbn3
    p['upconv2'] = convT(310, 91)
    p['convup2_a'], p['convup2_b'] = conv3_reused(91, 91)    # + upbn2
    p['upconv1'] = convT(155, 45)
    p['convup1_a'], p['convup1_b'] = conv3_reused(45, 45)    # + upbn1
    p['outconv'] = conv1(45, num_classes)
    return p


# ---------------------------------------------------------------------------
# UNet_D forward (Dropout = identity, BN = folded running stats)
# ---------------------------------------------------------------------------
def unet_d_forward(x_nchw, p):
    x = jnp.transpose(x_nchw, (0, 2, 3, 1))              # NCHW -> NHWC

    x0 = conv3x3(x, p['conv11'])
    x1 = conv3x3(x0, p['conv12'], relu=True)             # bn1 + relu, Dropout=id
    x1 = maxpool2(x1)
    x2 = conv3x3(x1, p['conv22'])
    x2 = conv3x3(x2, p['conv222'], relu=True)
    x2 = maxpool2(x2)
    x3 = conv3x3(x2, p['conv33'])
    x3 = conv3x3(x3, p['conv333'], relu=True)
    x3 = maxpool2(x3)
    x4 = conv3x3(x3, p['conv44'])
    x4 = conv3x3(x4, p['conv444'], relu=True)
    x4 = maxpool2(x4)

    # decoder
    y = conv1x1(x4, p['upconv41'])
    y = eca(y, p['eca4'])
    y = conv_transpose2x2(y, p['upconv4'])
    y = conv3x3(y, p['convup4_a'])                       # same Conv2d applied twice
    xd4 = conv3x3(y, p['convup4_b'], relu=True)
    xd4 = jnp.concatenate([xd4, x3], axis=-1)

    y = conv_transpose2x2(xd4, p['upconv3'])
    y = conv3x3(y, p['convup3_a'])
    xd3 = conv3x3(y, p['convup3_b'], relu=True)
    xd3 = jnp.concatenate([xd3, x2], axis=-1)

    y = conv_transpose2x2(xd3, p['upconv2'])
    y = conv3x3(y, p['convup2_a'])
    xd2 = conv3x3(y, p['convup2_b'], relu=True)
    xd2 = jnp.concatenate([xd2, x1], axis=-1)

    y = conv_transpose2x2(xd2, p['upconv1'])
    y = conv3x3(y, p['convup1_a'])
    xd1 = conv3x3(y, p['convup1_b'], relu=True)

    out = conv1x1(xd1, p['outconv'])
    return jnp.transpose(out, (0, 3, 1, 2))              # NHWC -> NCHW


if __name__ == "__main__":
    key = jax.random.PRNGKey(0)
    k_params, k_x, k_t0, k_t1, k_t2, k_t3, k_t4 = jax.random.split(key, 7)

    # --- lightweight self-test: conv3x3 kernel vs. pure-JAX reference -------
    th, tw_ = 8, 8
    cin_t, cout_t = 16, 32
    w_t = jax.random.normal(k_t1, (3, 3, cin_t, cout_t), jnp.float32) * 0.1
    b_t = jax.random.normal(k_t2, (cout_t,), jnp.float32) * 0.1
    sc_t = jax.random.uniform(k_t3, (cout_t,), jnp.float32, 0.5, 1.5)
    sh_t = jax.random.normal(k_t4, (cout_t,), jnp.float32) * 0.1
    x_t = jax.random.normal(k_t0, (2, th, tw_, cin_t), jnp.float32)
    got = conv3x3(x_t, _prep_conv3(w_t, b_t, sc_t, sh_t), relu=True)

    xbf = x_t.astype(jnp.bfloat16).astype(jnp.float32)
    wbf = w_t.astype(jnp.bfloat16).astype(jnp.float32)
    xpad = jnp.pad(xbf, ((0, 0), (1, 1), (1, 1), (0, 0)))
    ref = sum(jnp.einsum('bhwc,co->bhwo', xpad[:, dy:dy + th, dx:dx + tw_, :],
                         wbf[dy, dx], precision=jax.lax.Precision.HIGHEST)
              for dy in range(3) for dx in range(3))
    ref = jnp.maximum((ref + b_t) * sc_t + sh_t, 0.0)
    assert jnp.allclose(got, ref, atol=2e-2, rtol=2e-2), \
        float(jnp.max(jnp.abs(got - ref)))

    # --- full UNet_D forward -------------------------------------------------
    num_classes = 2
    params = init_params(k_params, num_classes)

    # Input matches PyTorch NCHW convention; spatial must be divisible by 16.
    x = jax.random.normal(k_x, (2, 3, 16, 16), jnp.float32)

    fwd = jax.jit(lambda t: unet_d_forward(t, params))
    out = jax.block_until_ready(fwd(x))
    assert out.shape == (2, num_classes, 16, 16), out.shape
    assert bool(jnp.all(jnp.isfinite(out)))
    print("KERNEL_OK")
</pallas_src>

<mosaic_0001>
module attributes {stable_mosaic.version = 11 : i64} {
  func.func @_conv3x3_kernel(%arg0: i32, %arg1: i32, %arg2: i32, %arg3: memref<1x121x128xbf16, #tpu.memory_space<vmem>>, %arg4: memref<9x128x128xbf16, #tpu.memory_space<vmem>>, %arg5: memref<1x128xf32, #tpu.memory_space<vmem>>, %arg6: memref<1x128xf32, #tpu.memory_space<vmem>>, %arg7: memref<1x88x128xf32, #tpu.memory_space<vmem>>, %arg8: memref<88x128xf32, #tpu.memory_space<vmem>>) attributes {dimension_semantics = [#tpu.dimension_semantics<parallel>, #tpu.dimension_semantics<parallel>, #tpu.dimension_semantics<arbitrary>], iteration_bounds = array<i64: 2, 1, 1>, scalar_prefetch = 0 : i64, scratch_operands = 1 : i64, tpu.core_type = #tpu.core_type<tc>, window_params = [{transform_indices = @transform_0, window_bounds = array<i64: 1, 121, 128>}, {transform_indices = @transform_1, window_bounds = array<i64: 9, 128, 128>}, {transform_indices = @transform_2, window_bounds = array<i64: 1, 128>}, {transform_indices = @transform_3, window_bounds = array<i64: 1, 128>}, {transform_indices = @transform_4, window_bounds = array<i64: 1, 88, 128>}]} {
    %c0_i32 = arith.constant 0 : i32
    %0 = arith.cmpi eq, %arg2, %c0_i32 : i32
    %1 = arith.extui %0 : i1 to i32
    %c0_i32_0 = arith.constant 0 : i32
    %2 = arith.cmpi ne, %1, %c0_i32_0 : i32
    scf.if %2 {
      %cst_86 = arith.constant 0.000000e+00 : f32
      %78 = vector.broadcast %cst_86 : f32 to vector<88x128xf32>
      %c0_87 = arith.constant 0 : index
      %c0_88 = arith.constant 0 : index
      %79 = vector.load %arg8[%c0_87, %c0_88] : memref<88x128xf32, #tpu.memory_space<vmem>>, vector<88x128xf32>
      tpu.vector_store %arg8[%c0_87, %c0_88], %78 {strides = array<i32>} : memref<88x128xf32, #tpu.memory_space<vmem>>, vector<88x128xf32>,
    } else {
    }
    %c0 = arith.constant 0 : index
    %c0_1 = arith.constant 0 : index
    %c0_2 = arith.constant 0 : index
    %3 = vector.load %arg3[%c0, %c0_1, %c0_2] : memref<1x121x128xbf16, #tpu.memory_space<vmem>>, vector<1x88x128xbf16>
    %4 = vector.shape_cast %3 : vector<1x88x128xbf16> to vector<88x128xbf16>
    %c0_3 = arith.constant 0 : index
    %c0_4 = arith.constant 0 : index
    %5 = vector.load %arg8[%c0_3, %c0_4] : memref<88x128xf32, #tpu.memory_space<vmem>>, vector<88x128xf32>
    %c0_5 = arith.constant 0 : index
    %c0_6 = arith.constant 0 : index
    %c0_7 = arith.constant 0 : index
    %6 = vector.load %arg4[%c0_5, %c0_6, %c0_7] : memref<9x128x128xbf16, #tpu.memory_space<vmem>>, vector<1x128x128xbf16>
    %7 = vector.shape_cast %6 : vector<1x128x128xbf16> to vector<128x128xbf16>
    %cst = arith.constant dense<0.000000e+00> : vector<88x128xf32>
    %8 = tpu.matmul %4, %7, %cst {dimension_numbers = #tpu.dot_dimension_numbers<[1], [0], [0], [1], [0, 0, 1, 1], [], []>} : vector<88x128xbf16>, vector<128x128xbf16>, vector<88x128xf32> -> vector<88x128xf32>
    %9 = arith.addf %5, %8 : vector<88x128xf32>
    %c0_8 = arith.constant 0 : index
    %c0_9 = arith.constant 0 : index
    %10 = vector.load %arg8[%c0_8, %c0_9] : memref<88x128xf32, #tpu.memory_space<vmem>>, vector<88x128xf32>
    tpu.vector_store %arg8[%c0_8, %c0_9], %9 {strides = array<i32>} : memref<88x128xf32, #tpu.memory_space<vmem>>, vector<88x128xf32>,
    %c0_10 = arith.constant 0 : index
    %c1 = arith.constant 1 : index
    %c0_11 = arith.constant 0 : index
    %11 = vector.load %arg3[%c0_10, %c1, %c0_11] : memref<1x121x128xbf16, #tpu.memory_space<vmem>>, vector<1x88x128xbf16>
    %12 = vector.shape_cast %11 : vector<1x88x128xbf16> to vector<88x128xbf16>
    %c0_12 = arith.constant 0 : index
    %c0_13 = arith.constant 0 : index
    %13 = vector.load %arg8[%c0_12, %c0_13] : memref<88x128xf32, #tpu.memory_space<vmem>>, vector<88x128xf32>
    %c1_14 = arith.constant 1 : index
    %c0_15 = arith.constant 0 : index
    %c0_16 = arith.constant 0 : index
    %14 = vector.load %arg4[%c1_14, %c0_15, %c0_16] : memref<9x128x128xbf16, #tpu.memory_space<vmem>>, vector<1x128x128xbf16>
    %15 = vector.shape_cast %14 : vector<1x128x128xbf16> to vector<128x128xbf16>
    %cst_17 = arith.constant dense<0.000000e+00> : vector<88x128xf32>
    %16 = tpu.matmul %12, %15, %cst_17 {dimension_numbers = #tpu.dot_dimension_numbers<[1], [0], [0], [1], [0, 0, 1, 1], [], []>} : vector<88x128xbf16>, vector<128x128xbf16>, vector<88x128xf32> -> vector<88x128xf32>
    %17 = arith.addf %13, %16 : vector<88x128xf32>
    %c0_18 = arith.constant 0 : index
    %c0_19 = arith.constant 0 : index
    %18 = vector.load %arg8[%c0_18, %c0_19] : memref<88x128xf32, #tpu.memory_space<vmem>>, vector<88x128xf32>
    tpu.vector_store %arg8[%c0_18, %c0_19], %17 {strides = array<i32>} : memref<88x128xf32, #tpu.memory_space<vmem>>, vector<88x128xf32>,
    %c0_20 = arith.constant 0 : index
    %c2 = arith.constant 2 : index
    %c0_21 = arith.constant 0 : index
    %19 = vector.load %arg3[%c0_20, %c2, %c0_21] : memref<1x121x128xbf16, #tpu.memory_space<vmem>>, vector<1x88x128xbf16>
    %20 = vector.shape_cast %19 : vector<1x88x128xbf16> to vector<88x128xbf16>
    %c0_22 = arith.constant 0 : index
    %c0_23 = arith.constant 0 : index
    %21 = vector.load %arg8[%c0_22, %c0_23] : memref<88x128xf32, #tpu.memory_space<vmem>>, vector<88x128xf32>
    %c2_24 = arith.constant 2 : index
    %c0_25 = arith.constant 0 : index
    %c0_26 = arith.constant 0 : index
    %22 = vector.load %arg4[%c2_24, %c0_25, %c0_26] : memref<9x128x128xbf16, #tpu.memory_space<vmem>>, vector<1x128x128xbf16>
    %23 = vector.shape_cast %22 : vector<1x128x128xbf16> to vector<128x128xbf16>
    %cst_27 = arith.constant dense<0.000000e+00> : vector<88x128xf32>
    %24 = tpu.matmul %20, %23, %cst_27 {dimension_numbers = #tpu.dot_dimension_numbers<[1], [0], [0], [1], [0, 0, 1, 1], [], []>} : vector<88x128xbf16>, vector<128x128xbf16>, vector<88x128xf32> -> vector<88x128xf32>
    %25 = arith.addf %21, %24 : vector<88x128xf32>
    %c0_28 = arith.constant 0 : index
    %c0_29 = arith.constant 0 : index
    %26 = vector.load %arg8[%c0_28, %c0_29] : memref<88x128xf32, #tpu.memory_space<vmem>>, vector<88x128xf32>
    tpu.vector_store %arg8[%c0_28, %c0_29], %25 {strides = array<i32>} : memref<88x128xf32, #tpu.memory_space<vmem>>, vector<88x128xf32>,
    %c0_30 = arith.constant 0 : index
    %c11 = arith.constant 11 : index
    %c0_31 = arith.constant 0 : index
    %27 = vector.load %arg3[%c0_30, %c11, %c0_31] : memref<1x121x128xbf16, #tpu.memory_space<vmem>>, vector<1x88x128xbf16>
    %28 = vector.shape_cast %27 : vector<1x88x128xbf16> to vector<88x128xbf16>
    %c0_32 = arith.constant 0 : index
    %c0_33 = arith.constant 0 : index
    %29 = vector.load %arg8[%c0_32, %c0_33] : memref<88x128xf32, #tpu.memory_space<vmem>>, vector<88x128xf32>
    %c3 = arith.constant 3 : index
    %c0_34 = arith.constant 0 : index
    %c0_35 = arith.constant 0 : index
    %30 = vector.load %arg4[%c3, %c0_34, %c0_35] : memref<9x128x128xbf16, #tpu.memory_space<vmem>>, vector<1x128x128xbf16>
    %31 = vector.shape_cast %30 : vector<1x128x128xbf16> to vector<128x128xbf16>
    %cst_36 = arith.constant dense<0.000000e+00> : vector<88x128xf32>
    %32 = tpu.matmul %28, %31, %cst_36 {dimension_numbers = #tpu.dot_dimension_numbers<[1], [0], [0], [1], [0, 0, 1, 1], [], []>} : vector<88x128xbf16>, vector<128x128xbf16>, vector<88x128xf32> -> vector<88x128xf32>
    %33 = arith.addf %29, %32 : vector<88x128xf32>
    %c0_37 = arith.constant 0 : index
    %c0_38 = arith.constant 0 : index
    %34 = vector.load %arg8[%c0_37, %c0_38] : memref<88x128xf32, #tpu.memory_space<vmem>>, vector<88x128xf32>
    tpu.vector_store %arg8[%c0_37, %c0_38], %33 {strides = array<i32>} : memref<88x128xf32, #tpu.memory_space<vmem>>, vector<88x128xf32>,
    %c0_39 = arith.constant 0 : index
    %c12 = arith.constant 12 : index
    %c0_40 = arith.constant 0 : index
    %35 = vector.load %arg3[%c0_39, %c12, %c0_40] : memref<1x121x128xbf16, #tpu.memory_space<vmem>>, vector<1x88x128xbf16>
    %36 = vector.shape_cast %35 : vector<1x88x128xbf16> to vector<88x128xbf16>
    %c0_41 = arith.constant 0 : index
    %c0_42 = arith.constant 0 : index
    %37 = vector.load %arg8[%c0_41, %c0_42] : memref<88x128xf32, #tpu.memory_space<vmem>>, vector<88x128xf32>
    %c4 = arith.constant 4 : index
    %c0_43 = arith.constant 0 : index
    %c0_44 = arith.constant 0 : index
    %38 = vector.load %arg4[%c4, %c0_43, %c0_44] : memref<9x128x128xbf16, #tpu.memory_space<vmem>>, vector<1x128x128xbf16>
    %39 = vector.shape_cast %38 : vector<1x128x128xbf16> to vector<128x128xbf16>
    %cst_45 = arith.constant dense<0.000000e+00> : vector<88x128xf32>
    %40 = tpu.matmul %36, %39, %cst_45 {dimension_numbers = #tpu.dot_dimension_numbers<[1], [0], [0], [1], [0, 0, 1, 1], [], []>} : vector<88x128xbf16>, vector<128x128xbf16>, vector<88x128xf32> -> vector<88x128xf32>
    %41 = arith.addf %37, %40 : vector<88x128xf32>
    %c0_46 = arith.constant 0 : index
    %c0_47 = arith.constant 0 : index
    %42 = vector.load %arg8[%c0_46, %c0_47] : memref<88x128xf32, #tpu.memory_space<vmem>>, vector<88x128xf32>
    tpu.vector_store %arg8[%c0_46, %c0_47], %41 {strides = array<i32>} : memref<88x128xf32, #tpu.memory_space<vmem>>, vector<88x128xf32>,
    %c0_48 = arith.constant 0 : index
    %c13 = arith.constant 13 : index
    %c0_49 = arith.constant 0 : index
    %43 = vector.load %arg3[%c0_48, %c13, %c0_49] : memref<1x121x128xbf16, #tpu.memory_space<vmem>>, vector<1x88x128xbf16>
    %44 = vector.shape_cast %43 : vector<1x88x128xbf16> to vector<88x128xbf16>
    %c0_50 = arith.constant 0 : index
    %c0_51 = arith.constant 0 : index
    %45 = vector.load %arg8[%c0_50, %c0_51] : memref<88x128xf32, #tpu.memory_space<vmem>>, vector<88x128xf32>
    %c5 = arith.constant 5 : index
    %c0_52 = arith.constant 0 : index
    %c0_53 = arith.constant 0 : index
    %46 = vector.load %arg4[%c5, %c0_52, %c0_53] : memref<9x128x128xbf16, #tpu.memory_space<vmem>>, vector<1x128x128xbf16>
    %47 = vector.shape_cast %46 : vector<1x128x128xbf16> to vector<128x128xbf16>
    %cst_54 = arith.constant dense<0.000000e+00> : vector<88x128xf32>
    %48 = tpu.matmul %44, %47, %cst_54 {dimension_numbers = #tpu.dot_dimension_numbers<[1], [0], [0], [1], [0, 0, 1, 1], [], []>} : vector<88x128xbf16>, vector<128x128xbf16>, vector<88x128xf32> -> vector<88x128xf32>
    %49 = arith.addf %45, %48 : vector<88x128xf32>
    %c0_55 = arith.constant 0 : index
    %c0_56 = arith.constant 0 : index
    %50 = vector.load %arg8[%c0_55, %c0_56] : memref<88x128xf32, #tpu.memory_space<vmem>>, vector<88x128xf32>
    tpu.vector_store %arg8[%c0_55, %c0_56], %49 {strides = array<i32>} : memref<88x128xf32, #tpu.memory_space<vmem>>, vector<88x128xf32>,
    %c0_57 = arith.constant 0 : index
    %c22 = arith.constant 22 : index
    %c0_58 = arith.constant 0 : index
    %51 = vector.load %arg3[%c0_57, %c22, %c0_58] : memref<1x121x128xbf16, #tpu.memory_space<vmem>>, vector<1x88x128xbf16>
    %52 = vector.shape_cast %51 : vector<1x88x128xbf16> to vector<88x128xbf16>
    %c0_59 = arith.constant 0 : index
    %c0_60 = arith.constant 0 : index
    %53 = vector.load %arg8[%c0_59, %c0_60] : memref<88x128xf32, #tpu.memory_space<vmem>>, vector<88x128xf32>
    %c6 = arith.constant 6 : index
    %c0_61 = arith.constant 0 : index
    %c0_62 = arith.constant 0 : index
    %54 = vector.load %arg4[%c6, %c0_61, %c0_62] : memref<9x128x128xbf16, #tpu.memory_space<vmem>>, vector<1x128x128xbf16>
    %55 = vector.shape_cast %54 : vector<1x128x128xbf16> to vector<128x128xbf16>
    %cst_63 = arith.constant dense<0.000000e+00> : vector<88x128xf32>
    %56 = tpu.matmul %52, %55, %cst_63 {dimension_numbers = #tpu.dot_dimension_numbers<[1], [0], [0], [1], [0, 0, 1, 1], [], []>} : vector<88x128xbf16>, vector<128x128xbf16>, vector<88x128xf32> -> vector<88x128xf32>
    %57 = arith.addf %53, %56 : vector<88x128xf32>
    %c0_64 = arith.constant 0 : index
    %c0_65 = arith.constant 0 : index
    %58 = vector.load %arg8[%c0_64, %c0_65] : memref<88x128xf32, #tpu.memory_space<vmem>>, vector<88x128xf32>
    tpu.vector_store %arg8[%c0_64, %c0_65], %57 {strides = array<i32>} : memref<88x128xf32, #tpu.memory_space<vmem>>, vector<88x128xf32>,
    %c0_66 = arith.constant 0 : index
    %c23 = arith.constant 23 : index
    %c0_67 = arith.constant 0 : index
    %59 = vector.load %arg3[%c0_66, %c23, %c0_67] : memref<1x121x128xbf16, #tpu.memory_space<vmem>>, vector<1x88x128xbf16>
    %60 = vector.shape_cast %59 : vector<1x88x128xbf16> to vector<88x128xbf16>
    %c0_68 = arith.constant 0 : index
    %c0_69 = arith.constant 0 : index
    %61 = vector.load %arg8[%c0_68, %c0_69] : memref<88x128xf32, #tpu.memory_space<vmem>>, vector<88x128xf32>
    %c7 = arith.constant 7 : index
    %c0_70 = arith.constant 0 : index
    %c0_71 = arith.constant 0 : index
    %62 = vector.load %arg4[%c7, %c0_70, %c0_71] : memref<9x128x128xbf16, #tpu.memory_space<vmem>>, vector<1x128x128xbf16>
    %63 = vector.shape_cast %62 : vector<1x128x128xbf16> to vector<128x128xbf16>
    %cst_72 = arith.constant dense<0.000000e+00> : vector<88x128xf32>
    %64 = tpu.matmul %60, %63, %cst_72 {dimension_numbers = #tpu.dot_dimension_numbers<[1], [0], [0], [1], [0, 0, 1, 1], [], []>} : vector<88x128xbf16>, vector<128x128xbf16>, vector<88x128xf32> -> vector<88x128xf32>
    %65 = arith.addf %61, %64 : vector<88x128xf32>
    %c0_73 = arith.constant 0 : index
    %c0_74 = arith.constant 0 : index
    %66 = vector.load %arg8[%c0_73, %c0_74] : memref<88x128xf32, #tpu.memory_space<vmem>>, vector<88x128xf32>
    tpu.vector_store %arg8[%c0_73, %c0_74], %65 {strides = array<i32>} : memref<88x128xf32, #tpu.memory_space<vmem>>, vector<88x128xf32>,
    %c0_75 = arith.constant 0 : index
    %c24 = arith.constant 24 : index
    %c0_76 = arith.constant 0 : index
    %67 = vector.load %arg3[%c0_75, %c24, %c0_76] : memref<1x121x128xbf16, #tpu.memory_space<vmem>>, vector<1x88x128xbf16>
    %68 = vector.shape_cast %67 : vector<1x88x128xbf16> to vector<88x128xbf16>
    %c0_77 = arith.constant 0 : index
    %c0_78 = arith.constant 0 : index
    %69 = vector.load %arg8[%c0_77, %c0_78] : memref<88x128xf32, #tpu.memory_space<vmem>>, vector<88x128xf32>
    %c8 = arith.constant 8 : index
    %c0_79 = arith.constant 0 : index
    %c0_80 = arith.constant 0 : index
    %70 = vector.load %arg4[%c8, %c0_79, %c0_80] : memref<9x128x128xbf16, #tpu.memory_space<vmem>>, vector<1x128x128xbf16>
    %71 = vector.shape_cast %70 : vector<1x128x128xbf16> to vector<128x128xbf16>
    %cst_81 = arith.constant dense<0.000000e+00> : vector<88x128xf32>
    %72 = tpu.matmul %68, %71, %cst_81 {dimension_numbers = #tpu.dot_dimension_numbers<[1], [0], [0], [1], [0, 0, 1, 1], [], []>} : vector<88x128xbf16>, vector<128x128xbf16>, vector<88x128xf32> -> vector<88x128xf32>
    %73 = arith.addf %69, %72 : vector<88x128xf32>
    %c0_82 = arith.constant 0 : index
    %c0_83 = arith.constant 0 : index
    %74 = vector.load %arg8[%c0_82, %c0_83] : memref<88x128xf32, #tpu.memory_space<vmem>>, vector<88x128xf32>
    tpu.vector_store %arg8[%c0_82, %c0_83], %73 {strides = array<i32>} : memref<88x128xf32, #tpu.memory_space<vmem>>, vector<88x128xf32>,
    %c0_i32_84 = arith.constant 0 : i32
    %75 = arith.cmpi eq, %arg2, %c0_i32_84 : i32
    %76 = arith.extui %75 : i1 to i32
    %c0_i32_85 = arith.constant 0 : i32
    %77 = arith.cmpi ne, %76, %c0_i32_85 : i32
    scf.if %77 {
      %c0_86 = arith.constant 0 : index
      %c0_87 = arith.constant 0 : index
      %78 = vector.load %arg8[%c0_86, %c0_87] : memref<88x128xf32, #tpu.memory_space<vmem>>, vector<88x128xf32>
      %c0_88 = arith.constant 0 : index
      %c0_89 = arith.constant 0 : index
      %79 = vector.load %arg5[%c0_88, %c0_89] : memref<1x128xf32, #tpu.memory_space<vmem>>, vector<1x128xf32>
      %80 = vector.broadcast %79 : vector<1x128xf32> to vector<88x128xf32>
      %81 = arith.mulf %78, %80 : vector<88x128xf32>
      %c0_90 = arith.constant 0 : index
      %c0_91 = arith.constant 0 : index
      %82 = vector.load %arg6[%c0_90, %c0_91] : memref<1x128xf32, #tpu.memory_space<vmem>>, vector<1x128xf32>
      %83 = vector.broadcast %82 : vector<1x128xf32> to vector<88x128xf32>
      %84 = arith.addf %81, %83 : vector<88x128xf32>
      %cst_92 = arith.constant 0.000000e+00 : f32
      %85 = vector.broadcast %cst_92 : f32 to vector<88x128xf32>
      %86 = arith.maximumf %84, %85 : vector<88x128xf32>
      %c0_93 = arith.constant 0 : index
      %c0_94 = arith.constant 0 : index
      %c0_95 = arith.constant 0 : index
      %87 = vector.load %arg7[%c0_93, %c0_94, %c0_95] : memref<1x88x128xf32, #tpu.memory_space<vmem>>, vector<1x88x128xf32>
      %88 = vector.shape_cast %87 : vector<1x88x128xf32> to vector<88x128xf32>
      %89 = vector.shape_cast %86 : vector<88x128xf32> to vector<1x88x128xf32>
      tpu.vector_store %arg7[%c0_93, %c0_94, %c0_95], %89 {strides = array<i32>} : memref<1x88x128xf32, #tpu.memory_space<vmem>>, vector<1x88x128xf32>,
    } else {
    }
    return
  }
  func.func @transform_0(%arg0: i32, %arg1: i32, %arg2: i32) -> (i32, i32, i32) {
    %c0_i32 = arith.constant 0 : i32
    %c0_i32_0 = arith.constant 0 : i32
    return %arg0, %c0_i32, %arg2 : i32, i32, i32
  }
  func.func @transform_1(%arg0: i32, %arg1: i32, %arg2: i32) -> (i32, i32, i32) {
    %c0_i32 = arith.constant 0 : i32
    %c0_i32_0 = arith.constant 0 : i32
    return %c0_i32, %arg2, %arg1 : i32, i32, i32
  }
  func.func @transform_2(%arg0: i32, %arg1: i32, %arg2: i32) -> (i32, i32) {
    %c0_i32 = arith.constant 0 : i32
    %c0_i32_0 = arith.constant 0 : i32
    return %c0_i32, %arg1 : i32, i32
  }
  func.func @transform_3(%arg0: i32, %arg1: i32, %arg2: i32) -> (i32, i32) {
    %c0_i32 = arith.constant 0 : i32
    %c0_i32_0 = arith.constant 0 : i32
    return %c0_i32, %arg1 : i32, i32
  }
  func.func @transform_4(%arg0: i32, %arg1: i32, %arg2: i32) -> (i32, i32, i32) {
    %c0_i32 = arith.constant 0 : i32
    %c0_i32_0 = arith.constant 0 : i32
    return %arg0, %c0_i32, %arg1 : i32, i32, i32
  }
}

</mosaic_0001>

<bundles_post_ra>
// kernel: tpu_custom_call.1
= control target key start
LH: loop header
LB: loop body
LE: loop exit
PB: predicated region body
PF: predicated region fallthrough
CT: control target
= control target key end

     0   :  { %9 = vsyncpa [#allocation4], 0  ;;  %s4046_s0 = inlined_call_operand.vmem [shape: bf16[2,121,128], index: 0, kind: input, shape index: {}]   ;;  %s4047_s1 = inlined_call_operand.hbm [shape: bf16[9,128,128], index: 1, kind: input, shape index: {}]   ;;  %s4048_s2 = inlined_call_operand.vmem [shape: f32[1,128], index: 2, kind: input, shape index: {}]   ;;  %s4049_s3 = inlined_call_operand.vmem [shape: f32[1,128], index: 3, kind: input, shape index: {}]   ;;  %s4050_s4 = inlined_call_operand.hbm [shape: f32[2,88,128], index: 4, kind: output, shape index: {}]  }
   0x1   :  { %10 = vsyncpa [#allocation5], 0 }
   0x2   :  { %12 = vsyncpa [#allocation5 + $0x1], 0  ;;  %s3752_s15 = smov 0   ;;  %s3754_s16 = smov 0  }
   0x3   :  { %s3756_s17 = smov 0   ;;  %s3758_s18 = smov 0  }
   0x4   :  { %s3760_s19 = smov 0   ;;  %s3762_s20 = smov 0  }
   0x5 LB: > { %s2780_s21 = sadd.s32 4294967295, %s3719_s20   ;;  %s2781_s22 = sadd.s32 4294967294, %s3719_s20   ;;  %s3719_s20 = sphi %s3762_s20, %s18_s20   ;;  %s3715_s19 = sphi %s3760_s19, %s4068_s19   ;;  %s3711_s18 = sphi %s3758_s18, %s4067_s18   ;;  %s3707_s17 = sphi %s3756_s17, %s4066_s17   ;;  %s3703_s16 = sphi %s3754_s16, %s4065_s16   ;;  %s3699_s15 = sphi %s3752_s15, %s4064_s15  }
   0x6   : > { %s37_s23 = sadd.s32 1, %s3715_s19  ;;  %s154_s24 = sadd.s32 1, %s3707_s17 }
   0x7   : > { %p39_p0 = scmp.ge.s32.totalorder %s37_s23, 2  ;;  %p164_p1 = scmp.ne.s32.totalorder %s3707_s17, %s3703_s16 }
   0x8   : > { %p165_p2 = scmp.eq.s32.totalorder %s2780_s21, 1  ;;  %p170_p3 = scmp.ne.s32.totalorder %s3703_s16, %s3699_s15 }
   0x9   : > { %s4070_s23 = smov (%p39_p0, %s37_s23), 0  ;;  %p171_p5 = scmp.eq.s32.totalorder %s2781_s22, 1 }
   0xa   : > { %p3792_p4 = por %p165_p2, %p164_p1  ;;  %s149_s26 = ssub.s32 %s3715_s19, %s4070_s23 }
   0xb   : > { %p2782_p6 = scmp.ge.s32.totalorder %s3719_s20, 1  ;;  %p152_p7 = scmp.eq.s32.totalorder %s149_s26, 0 }
   0xc   : > { %s4055_s25 = scalar_select %p3792_p4, 1, 0 }
   0xd   : > { %p3799_p8 = por %p171_p5, %p170_p3  ;;  %p178_p9 = scmp.lt.s32.totalorder %s3719_s20, 3 }
   0xe   : > { %s3805_s28 = scalar_select %p152_p7, %s3707_s17, %s154_s24  }
   0xf   : > { %s4056_s27 = scalar_select %p3799_p8, 1, 0 }
  0x10   : > { %p3807_p10 = pnand %p2782_p6, %p178_p9  ;;  %p3811_p11 = scmp.eq.s32.totalorder %s2780_s21, 0 }
  0x11   : > { %s3721_s5 = smov [#allocation3]   ;;  %s3609_s10 = scalar_lea.hbm %s4047_s1, 9216 }
  0x12   : > { %s4057_s29 = scalar_select %p3807_p10, 1, 0 }
  0x13   : > { %s4058_s30 = scalar_select %p3811_p11, 1, 0 }
  0x14   : > { %p3419_p12 = pneg %p3807_p10  ;;  %s194_s6 = sshll.u32 %s3721_s5, 4  ;;  %s195_s6 = int_to_ptr.vmem [resolvable:$true] %s194_s6 }
  0x15   : > { %p3610_p0 = scmp.ne.s32.totalorder %s4047_s1, %s3609_s10  ;;  %p3616_p5 = scmp.lt.u32.totalorder %s3609_s10, %s4047_s1 }
  0x16   : > { %p3819_p13 = pnand %p3811_p11, %p3419_p12 }
  0x18   : > { %p3611_p1 = pneg %p3819_p13 }
  0x1a   : > { %p3612_p2 = pnand %p3611_p1, %p3610_p0 }
  0x1c   : > { %p3613_p3 = pneg %p3612_p2 }
  0x1e   : > { %p3618_p6 = pnand %p3616_p5, %p3613_p3 }
  0x20   : > { %3621 = shalt.err (!%p3618_p6)
}
  0x21   : > { %s3622_s21 = scalar_lea.vmem %s195_s6, 9216  ;;  %p3630_p8 = scmp.lt.s32.totalorder %s195_s6, %s195_s6 }
  0x22   : > { %p3623_p7 = scmp.ne.s32.totalorder %s195_s6, %s3622_s21  ;;  %p3631_p4 = scmp.lt.s32.totalorder %s3622_s21, %s3622_s21 }
  0x24   : > { %p3625_p9 = pnand %p3623_p7, %p3611_p1  ;;  %p3632_p11 = por %p3631_p4, %p3630_p8 }
  0x26   : > { %p3626_p12 = pneg %p3625_p9 }
  0x28   : > { %p3633_p10 = pnand %p3632_p11, %p3626_p12 }
  0x2a   : > { %3636 = shalt.err (!%p3633_p10)
}
  0x2b   : > { %s3722_s22 = smov 64   ;;  %s3723_s24 = smov 4  }
  0x2c   : > { %3422 = dma.hbm_to_vmem [thread:$0]  (!%p3819_p13), %s4047_s1, 9216, %s195_s6, [#allocation4], %s3722_s22, %s3722_s22, %s3723_s24  }
  0x2d   : > { %p4060_p0 = scmp.ne.s32.totalorder %s4057_s29, 0 }
  0x2e   : > { %p4061_p2 = scmp.ne.s32.totalorder (!%p4060_p0), %s4058_s30, 0 }
  0x2f   : > { %233 = sbr.rel (%p4060_p0) target bundleno = 462 (0x1ce), region = 36 }
  0x36   : > { %3690 = dma.done.wait (%p4061_p2), [#allocation4], 9216  }
  0x37   : > { %3692 = vsyncadd (%p4061_p2), [#allocation4], 4294958080  ;;  %v3483_v0 = vld [vmem:[#allocation3] sm:$0xff]   ;;  %v3485_v2 = vld [vmem:[#allocation3 + $0x8] sm:$0xff]   ;;  %p268_p4 = scmp.lt.s32.totalorder %s3711_s18, 1  ;;  %vm1383_vm0 = vcmask 1045504  }
  0x38   : > { %v3484_v1 = vld [vmem:[#allocation3 + $0x100] sm:$0xff]   ;;  %3049 = vmatprep.subr.bf16.mxu1 %v3483_v0  ;;  %v3486_v3 = vld [vmem:[#allocation3 + $0x108] sm:$0xff]   ;;  %v3487_v4 = vld [vmem:[#allocation3 + $0x10] sm:$0xff]   ;;  %vm591_vm1 = vsmask.f32 7424  ;;  %vm865_vm3 = vcmask 1046528  }
  0x39   : > { %3161 = vmatprep.subr.bf16.mxu0 %v3484_v1  ;;  %3050 = vmatpush3.bf16.msra.mxu1 %v3483_v0  ;;  %v3488_v5 = vld [vmem:[#allocation3 + $0x110] sm:$0xff]   ;;  %v3489_v6 = vld [vmem:[#allocation3 + $0x18] sm:$0xff]   ;;  %s269_s29 = scalar_select %p268_p4, %s3711_s18, 1  ;;  %v3491_v8 = vld [vmem:[#allocation3 + $0x20] sm:$0xff]   ;;  %vm1621_vm2 = vsmask.f32 5376 }
  0x3a   : > { %3162 = vmatpush3.bf16.msra.mxu0 %v3484_v1  ;;  %3051 = vmatprep.subr.bf16.mxu1 %v3485_v2  ;;  %v3490_v7 = vld [vmem:[#allocation3 + $0x118] sm:$0xff]   ;;  %v3492_v9 = vld [vmem:[#allocation3 + $0x120] sm:$0xff]   ;;  %v3493_v10 = vld [vmem:[#allocation3 + $0x28] sm:$0xff]   ;;  %vm1901_vm4 = vcmask 1044480   ;;  %vm1103_vm5 = vsmask.f32 6400 }
  0x3b   : > { %3163 = vmatprep.subr.bf16.mxu0 %v3486_v3  ;;  %s2922_s30 = sshll.u32 %s269_s29, 6  ;;  %v3494_v12 = vld [vmem:[#allocation3 + $0x128] sm:$0xff]   ;;  %v3495_v13 = vld [vmem:[#allocation3 + $0x30] sm:$0xff]   ;;  %v3497_v19 = vld [vmem:[#allocation3 + $0x38] sm:$0xff]   ;;  %vm2139_vm6 = vsmask.f32 4352 }
  0x3c   : > { %s3850_s8 = scalar_lea.vmem %s4046_s0, %s2922_s30  ;;  %v3496_v16 = vld [vmem:[#allocation3 + $0x130] sm:$0xff]   ;;  %v3498_v22 = vld [vmem:[#allocation3 + $0x138] sm:$0xff]   ;;  %v3500_v23 = vld [vmem:[#allocation3 + $0x40] sm:$0xff]   ;;  %s265_s9 = sand.u32 1, %s3703_s16  }
  0x3d   : > { %3052 = vmatpush3.bf16.msra.mxu1 %v3485_v2  ;;  %v3499_v11 = vld [vmem:[%s3850_s8] sm:$0xff]   ;;  %v3502_v15 = vld [vmem:[%s3850_s8 + $0xc] sm:$0xff]   ;;  %v3505_v21 = vld [vmem:[%s3850_s8 + $0x14] sm:$0xff]   ;;  %s3959_s12 = smul.u32 88, %s265_s9  ;;  %p4062_p10 = scmp.ne.s32.totalorder %s4055_s25, 0 }
  0x3e   : > { %3164 = vmatpush3.bf16.msra.mxu0 %v3486_v3  ;;  %3053 = vmatprep.subr.bf16.mxu1 %v3487_v4  ;;  %v3501_v14 = vld [vmem:[%s3850_s8 + $0x4] sm:$0xfc]   ;;  %v1385_v18 = vrot.slane %v3502_v15, 2  ;;  %v1387_v25 = vrot.slane %v3505_v21, 2  ;;  %v3514_v30 = vld [vmem:[%s3850_s8 + $0x1c] sm:$0xff]   ;;  %v3512_v31 = vld [vmem:[%s3850_s8 + $0x10] sm:$0xff]  }
  0x3f   : > { %3165 = vmatprep.subr.bf16.mxu0 %v3488_v5  ;;  %3065 = vmatprep.mubr.bf16.mxu1 %v3499_v11  ;;  %v1384_v17 = vrot.slane %v3501_v14, 2  ;;  %v3503_v24 = vld [vmem:[#allocation3 + $0x140] sm:$0xff]   ;;  %v3504_v26 = vld [vmem:[%s3850_s8 + $0x8] sm:$0xff]   ;;  %v1389_v32 = vrot.slane %v3514_v30, 2  ;;  %v3508_v34 = vld [vmem:[#allocation3 + $0x50] sm:$0xff]   ;;  %s3973_s21 = scalar_lea.vmem [#allocation6], %s3959_s12 }
  0x40   : > { %v3506_v27 = vld [vmem:[#allocation3 + $0x48] sm:$0xff]   ;;  %v1388_v29 = vsel %vm1383_vm0, %v1385_v18, %v1387_v25  ;;  %v3509_v36 = vld [vmem:[#allocation3 + $0x150] sm:$0xff]   ;;  %v3516_v38 = vld [vmem:[%s3850_s8 + $0x18] sm:$0xff]   ;;  %s3412_s22 = smul.u32 1408, %s3711_s18  ;;  %s2659_s24 = sshll.u32 %s3973_s21, 4  ;;  %s3995_s24 = int_to_ptr.vmem [resolvable:$true] %s2659_s24 }
  0x41   : > { %3054 = vmatpush3.bf16.msra.mxu1 %v3487_v4  ;;  %v1386_v20 = vsel %vm1383_vm0, %v1384_v17, %v1385_v18  ;;  %v3507_v28 = vld [vmem:[#allocation3 + $0x148] sm:$0xff]   ;;  %v1390_v35 = vsel %vm1383_vm0, %v1387_v25, %v1389_v32  ;;  %v3510_v39 = vld [vmem:[#allocation3 + $0x58] sm:$0xff]   ;;  %v3520_v43 = vld [vmem:[%s3850_s8 + $0x20] sm:$0xff]   ;;  %s4000_s18 = scalar_lea.sflag [#allocation5], %s265_s9  ;;  %s3637_s30 = scalar_lea.vmem %s3995_s24, 1408 }
  0x42   : > { %3166 = vmatpush3.bf16.msra.mxu0 %v3488_v5  ;;  %3055 = vmatprep.subr.bf16.mxu1 %v3489_v6  ;;  %v3517_v33 = vld [vmem:[%s3850_s8 + $0x24] sm:$0xff]   ;;  %v3522_v41 = vld [vmem:[%s3850_s8 + $0x2c] sm:$0x3f]   ;;  %v3511_v42 = vld [vmem:[#allocation3 + $0x158] sm:$0xff]   ;;  %s3992_s29 = scalar_lea.hbm %s4050_s4, %s3412_s22  ;;  %p3638_p8 = scmp.ne.s32.totalorder %s3995_s24, %s3637_s30 }
  0x43   : > { %3167 = vmatprep.subr.bf16.mxu0 %v3490_v7  ;;  %3177 = vmatprep.mubr.bf16.mxu0 %v1386_v20  ;;  %v1391_v37 = vrot.slane %v3517_v33, 2  ;;  %v3513_v44 = vld [vmem:[#allocation3 + $0x60] sm:$0xff]   ;;  %v1393_v45 = vrot.slane %v3522_v41, 2  ;;  %v3528_v49 = vld [vmem:[%s3850_s8 + $0x8] sm:$0xff]   ;;  %v3521_v60 = vld [vmem:[#allocation3 + $0x70] sm:$0xff]   ;;  %s3724_s6 = smov [#allocation6]  }
  0x44   : > { %v3515_v46 = vld [vmem:[#allocation3 + $0x160] sm:$0xff]   ;;  %v3524_v50 = vld [vmem:[%s3850_s8 + $0x28] ss:$0 sps:$4 sm:$0xff]   ;;  %v600_v54 = vshll.u32 %v3528_v49, 16  ;;  %v3531_v59 = vld [vmem:[%s3850_s8 + $0xc] sm:$0xff]   ;;  %p3639_p11 = pnand %p3638_p8, %p4062_p10  ;;  %s3641_s7 = sshll.u32 %s3724_s6, 4  ;;  %s3642_s7 = int_to_ptr.vmem [resolvable:$false] %s3641_s7 }
  0x45   : > { %3056 = vmatpush3.bf16.msra.mxu1 %v3489_v6  ;;  %v1392_v40 = vsel %vm1383_vm0, %v1389_v32, %v1391_v37  ;;  %v1394_v47 = vsel %vm1383_vm0, %v1391_v37, %v1393_v45  ;;  %v3527_v48 = vld [vmem:[%s3850_s8] sm:$0xff]   ;;  %v3518_v51 = vld [vmem:[#allocation3 + $0x68] sm:$0xff]   ;;  %v3533_v0 = vld [vmem:[%s3850_s8 + $0x10] sm:$0xff]   ;;  %v1631_v2 = vshrl.u32 %v3531_v59, 16  ;;  %v1634_v3 = vshll.u32 %v3531_v59, 16  ;;  %p3644_p1 = scmp.lt.s32.totalorder %s3995_s24, %s3642_s7 }
  0x46   : > { %3168 = vmatpush3.bf16.msra.mxu0 %v3490_v7  ;;  %3057 = vmatprep.subr.bf16.mxu1 %v3491_v8  ;;  %v593_v52 = vshrl.u32 %v3527_v48, 16  ;;  %v595_v53 = vshll.u32 %v3527_v48, 16  ;;  %v3519_v55 = vld [vmem:[#allocation3 + $0x168] sm:$0xff]   ;;  %v602_v57 = vrot.slane %v600_v54, 1  ;;  %v3534_v1 = vld [vmem:[%s3850_s8 + $0x14] sm:$0xff]   ;;  %v608_v15 = vshll.u32 %v3533_v0, 16  ;;  %p3640_p13 = pneg %p3639_p11 }
  0x47   : > { %3169 = vmatprep.subr.bf16.mxu0 %v3492_v9  ;;  %v3530_v58 = vld [vmem:[%s3850_s8 + $0x4] sm:$0xfc]   ;;  %v3523_v4 = vld [vmem:[#allocation3 + $0x170] sm:$0xff]   ;;  %v1640_v11 = vshrl.u32 %v3534_v1, 16  ;;  %v3543_v32 = vld [vmem:[%s3850_s8 + $0x1c] sm:$0xff]  }
  0x48   : > { %v597_v56 = vrot.slane %v595_v53, 1  ;;  %v1623_v62 = vshrl.u32 %v3530_v58, 16  ;;  %v1626_v63 = vshll.u32 %v3530_v58, 16  ;;  %v3529_v20 = vld [vmem:[#allocation3 + $0x80] sm:$0xff]   ;;  %v1649_v37 = vshrl.u32 %v3543_v32, 16  ;;  %v3537_v41 = vld [vmem:[#allocation3 + $0x90] sm:$0xff]  }
  0x49   : > { %3058 = vmatpush3.bf16.msra.mxu1 %v3491_v8  ;;  %v3525_v8 = vld [vmem:[#allocation3 + $0x78] sm:$0xff]   ;;  %v1642_v17 = vrot.slane %v1640_v11, 2  ;;  %v3532_v25 = vld [vmem:[#allocation3 + $0x180] sm:$0xff]   ;;  %v3547_v11 = vld [vmem:[#allocation3 + $0xa8] sm:$0xff]  }
  0x4a   : > { %3170 = vmatpush3.bf16.msra.mxu0 %v3492_v9  ;;  %3059 = vmatprep.subr.bf16.mxu1 %v3493_v10  ;;  %v598_v61 = vor.u32 %v597_v56, %v593_v52  ;;  %v1625_v6 = vrot.slane %v1623_v62, 2  ;;  %v1628_v7 = vrot.slane %v1626_v63, 3  ;;  %v1633_v9 = vrot.slane %v1631_v2, 2  ;;  %v3551_v62 = vld [vmem:[%s3850_s8 + $0x2c] sm:$0x7f]   ;;  %v3540_v63 = vld [vmem:[#allocation3 + $0x198] sm:$0xff]  }
  0x4b   : > { %3171 = vmatprep.subr.bf16.mxu0 %v3494_v12 }
  0x4c   : > { %v603_v5 = vsel %vm591_vm1, %v598_v61, %v602_v57  ;;  %v1629_v14 = vor.u32 %v1628_v7, %v1625_v6  ;;  %v3544_v6 = vld [vmem:[#allocation3 + $0x1a0] sm:$0xff]  }
  0x4d   : > { %3060 = vmatpush3.bf16.msra.mxu1 %v3493_v10  ;;  %v1636_v10 = vrot.slane %v1634_v3, 3 }
  0x4e   : > { %3172 = vmatpush3.bf16.msra.mxu0 %v3494_v12  ;;  %3061 = vmatprep.subr.bf16.mxu1 %v3495_v13  ;;  %v1643_v12 = vshll.u32 %v3534_v1, 16  ;;  %v3542_v1 = vld [vmem:[#allocation3 + $0xa0] sm:$0xff]  }
  0x4f   : > { %3173 = vmatprep.subr.bf16.mxu0 %v3496_v16 }
  0x50   : > { %v1645_v18 = vrot.slane %v1643_v12, 3 }
  0x51   : > { %3062 = vmatpush3.bf16.msra.mxu1 %v3495_v13  ;;  %v604_v13 = vshrl.u32 %v3528_v49, 16 }
  0x52   : > { %3174 = vmatpush3.bf16.msra.mxu0 %v3496_v16  ;;  %3063 = vmatprep.subr.bf16.mxu1 %v3497_v19  ;;  %v1637_v16 = vor.u32 %v1636_v10, %v1633_v9  ;;  %v3555_v10 = vld [vmem:[%s3850_s8] sm:$0xfe]  }
  0x53   : > { %3175 = vmatprep.subr.bf16.mxu0 %v3498_v22 }
  0x54   : > { %v1638_v21 = vsel %vm1621_vm2, %v1629_v14, %v1637_v16  ;;  %v3556_v14 = vld [vmem:[%s3850_s8 + $0x8] sm:$0xff]  }
  0x55   : > { %3064 = vmatpush3.bf16.msra.mxu1 %v3497_v19  ;;  %v3526_v19 = vld [vmem:[#allocation3 + $0x178] sm:$0xff]  }
  0x56   : > { %3176 = vmatpush3.bf16.msra.mxu0 %v3498_v22  ;;  %3077 = vmatprep.subr.bf16.mxu1 %v3500_v23  ;;  %v606_v22 = vor.u32 %v604_v13, %v602_v57  ;;  %v3539_v57 = vld [vmem:[#allocation3 + $0x98] sm:$0xff]  }
  0x57   : > { %3189 = vmatprep.subr.bf16.mxu0 %v3503_v24 }
  0x58   : > { %3066 = vmatmul.mubr.bf16.vlgmr.msra.gmra.mrb[0].mxu1 %v3504_v26  ;;  %v1646_v26 = vor.u32 %v1645_v18, %v1642_v17  ;;  %v867_v18 = vrot.slane %v3556_v14, 1  ;;  %v3575_v14 = vld [vmem:[#allocation3 + $0xe8] sm:$0xff]  }
  0x59   : > { %3078 = vmatpush3.bf16.msra.mxu1 %v3500_v23  ;;  %3178 = vmatmul.mubr.bf16.vlgmr.msra.gmra.mrb[0].mxu0 %v1388_v29  ;;  %v610_v23 = vrot.slane %v608_v15, 1  ;;  %v3548_v15 = vld [vmem:[#allocation3 + $0x1a8] sm:$0xff]  }
  0x5a   : > { %3190 = vmatpush3.bf16.msra.mxu0 %v3503_v24  ;;  %3079 = vmatprep.subr.bf16.mxu1 %v3506_v27  ;;  %v612_v24 = vshrl.u32 %v3533_v0, 16  ;;  %v1647_v33 = vsel %vm1621_vm2, %v1637_v16, %v1646_v26  ;;  %v866_v16 = vrot.slane %v3555_v10, 1 }
  0x5b   : > { %3191 = vmatprep.subr.bf16.mxu0 %v3507_v28  ;;  %3069 = vmatprep.mubr.bf16.mxu1 %v3512_v31  ;;  %v611_v29 = vsel %vm591_vm1, %v606_v22, %v610_v23 }
  0x5c   : > { %3181 = vmatprep.mubr.bf16.mxu0 %v1390_v35  ;;  %v614_v30 = vor.u32 %v612_v24, %v610_v23  ;;  %v3550_v24 = vld [vmem:[#allocation3 + $0xb0] sm:$0xff]  }
  0x5d   : > { %3080 = vmatpush3.bf16.msra.mxu1 %v3506_v27  ;;  %v3541_v27 = vld [vmem:[%s3850_s8 + $0x18] sm:$0xff]  }
  0x5e   : > { %3192 = vmatpush3.bf16.msra.mxu0 %v3507_v28  ;;  %3081 = vmatprep.subr.bf16.mxu1 %v3508_v34  ;;  %v3535_v28 = vld [vmem:[#allocation3 + $0x88] sm:$0xff]   ;;  %v616_v31 = vshll.u32 %v3541_v27, 16  ;;  %v620_v35 = vshrl.u32 %v3541_v27, 16  ;;  %v3553_v27 = vld [vmem:[#allocation3 + $0xb8] sm:$0xff]  }
  0x5f   : > { %3193 = vmatprep.subr.bf16.mxu0 %v3509_v36 }
  0x60   : > { %3070 = vmatmul.mubr.bf16.gmra.mrb[4].mxu1 %v3516_v38  ;;  %v1652_v38 = vshll.u32 %v3543_v32, 16 }
  0x61   : > { %3082 = vmatpush3.bf16.msra.mxu1 %v3508_v34  ;;  %3182 = vmatmul.mubr.bf16.gmra.mrb[4].mxu0 %v1392_v40  ;;  %v3536_v34 = vld [vmem:[#allocation3 + $0x188] sm:$0xff]  }
  0x62   : > { %3194 = vmatpush3.bf16.msra.mxu0 %v3509_v36  ;;  %3083 = vmatprep.subr.bf16.mxu1 %v3510_v39  ;;  %v618_v36 = vrot.slane %v616_v31, 1  ;;  %v3546_v40 = vld [vmem:[%s3850_s8 + $0x24] sm:$0xff]  }
  0x63   : > { %3195 = vmatprep.subr.bf16.mxu0 %v3511_v42  ;;  %3073 = vmatprep.mubr.bf16.mxu1 %v3520_v43  ;;  %v1658_v48 = vshrl.u32 %v3546_v40, 16  ;;  %v1661_v49 = vshll.u32 %v3546_v40, 16  ;;  %v3557_v31 = vld [vmem:[#allocation3 + $0xc0] sm:$0xff]  }
  0x64   : > { %3185 = vmatprep.mubr.bf16.mxu0 %v1394_v47  ;;  %v619_v43 = vsel %vm591_vm1, %v614_v30, %v618_v36  ;;  %v3554_v30 = vld [vmem:[#allocation3 + $0x1b8] sm:$0xff]  }
  0x65   : > { %3084 = vmatpush3.bf16.msra.mxu1 %v3510_v39  ;;  %v3545_v39 = vld [vmem:[%s3850_s8 + $0x20] sm:$0xff]   ;;  %v1660_v53 = vrot.slane %v1658_v48, 2  ;;  %v1663_v54 = vrot.slane %v1661_v49, 3 }
  0x66   : > { %3196 = vmatpush3.bf16.msra.mxu0 %v3511_v42  ;;  %3085 = vmatprep.subr.bf16.mxu1 %v3513_v44  ;;  %v3538_v42 = vld [vmem:[#allocation3 + $0x190] sm:$0xff]   ;;  %v624_v47 = vshll.u32 %v3545_v39, 16 }
  0x67   : > { %3197 = vmatprep.subr.bf16.mxu0 %v3515_v46  ;;  %v1664_v59 = vor.u32 %v1663_v54, %v1660_v53  ;;  %v3567_v54 = vld [vmem:[#allocation3 + $0xd8] sm:$0xff]  }
  0x68   : > { %3074 = vmatmul.mubr.bf16.gmra.mrb[8].mxu1 %v3524_v50  ;;  %v628_v50 = vshrl.u32 %v3545_v39, 16  ;;  %v626_v52 = vrot.slane %v624_v47, 1 }
  0x69   : > { %3086 = vmatpush3.bf16.msra.mxu1 %v3513_v44  ;;  %3186 = vmatmul.mubr.bf16.gmra.mrb[8].mxu0 %v1393_v45  ;;  %v1651_v44 = vrot.slane %v1649_v37, 2  ;;  %v1654_v45 = vrot.slane %v1652_v38, 3  ;;  %v3571_v38 = vld [vmem:[%s3850_s8 + $0x20] sm:$0xff]  }
  0x6a   : > { %3198 = vmatpush3.bf16.msra.mxu0 %v3515_v46  ;;  %3087 = vmatprep.subr.bf16.mxu1 %v3518_v51  ;;  %v622_v46 = vor.u32 %v620_v35, %v618_v36  ;;  %v3570_v35 = vld [vmem:[%s3850_s8 + $0x20] sm:$0xff]   ;;  %v873_v47 = vrot.slane %v3571_v38, 1 }
  0x6b   : > { %3199 = vmatprep.subr.bf16.mxu0 %v3519_v55  ;;  %3093 = vmatprep.mubr.bf16.mxu1 %v603_v5  ;;  %v1670_v5 = vshll.u32 %v3551_v62, 16  ;;  %v3560_v36 = vld [vmem:[#allocation3 + $0x1c0] sm:$0xff]   ;;  %v1907_v40 = vrot.slane %v3570_v35, 3 }
  0x6c   : > { %3205 = vmatprep.mubr.bf16.mxu0 %v1638_v21  ;;  %v627_v58 = vsel %vm591_vm1, %v622_v46, %v626_v52  ;;  %v868_v21 = vsel %vm865_vm3, %v866_v16, %v867_v18 }
  0x6d   : > { %3088 = vmatpush3.bf16.msra.mxu1 %v3518_v51  ;;  %v1655_v51 = vor.u32 %v1654_v45, %v1651_v44  ;;  %v1672_v9 = vrot.slane %v1670_v5, 3  ;;  %v3564_v44 = vld [vmem:[#allocation3 + $0x1c8] sm:$0xff]   ;;  %v3565_v45 = vld [vmem:[#allocation3 + $0xd0] sm:$0xff]  }
  0x6e   : > { %3200 = vmatpush3.bf16.msra.mxu0 %v3519_v55  ;;  %3089 = vmatprep.subr.bf16.mxu1 %v3521_v60  ;;  %v3549_v55 = vld [vmem:[%s3850_s8 + $0x28] sm:$0x1f]   ;;  %v3586_v5 = vld [vmem:[%s3850_s8 + $0x10] sm:$0xff]  }
  0x6f   : > { %3201 = vmatprep.subr.bf16.mxu0 %v3523_v4  ;;  %v1656_v56 = vsel %vm1621_vm2, %v1646_v26, %v1655_v51  ;;  %v632_v61 = vshll.u32 %v3549_v55, 16  ;;  %v636_v0 = vshrl.u32 %v3549_v55, 16  ;;  %v1665_v2 = vsel %vm1621_vm2, %v1655_v51, %v1664_v59  ;;  %v3911_v51 = vld [vmem:[%s3850_s8 + $0x30] sm:$0x7f]  }
  0x70   : > { %v2149_v16 = vshrl.u32 %v3586_v5, 16 }
  0x71   : > { %3090 = vmatpush3.bf16.msra.mxu1 %v3521_v60  ;;  %v630_v60 = vor.u32 %v628_v50, %v626_v52  ;;  %v634_v3 = vrot.slane %v632_v61, 1  ;;  %v3908_v50 = vld [vmem:[%s3850_s8 + $0x28] sm:$0x1f]   ;;  %v3566_v52 = vld [vmem:[#allocation3 + $0x1d0] sm:$0xff]  }
  0x72   : > { %3202 = vmatpush3.bf16.msra.mxu0 %v3523_v4  ;;  %3091 = vmatprep.subr.bf16.mxu1 %v3525_v8  ;;  %v1667_v4 = vshrl.u32 %v3551_v62, 16  ;;  %v875_v53 = vrot.slane %v3908_v50, 1  ;;  %v3584_v61 = vld [vmem:[%s3850_s8 + $0xc] sm:$0xff]  }
  0x73   : > { %3203 = vmatprep.subr.bf16.mxu0 %v3526_v19  ;;  %v635_v7 = vsel %vm591_vm1, %v630_v60, %v634_v3  ;;  %v638_v13 = vor.u32 %v636_v0, %v634_v3  ;;  %v1116_v3 = vshll.u32 %v3584_v61, 16 }
  0x74   : > { %v876_v60 = vsel %vm865_vm3, %v873_v47, %v875_v53 }
  0x75   : > { %3092 = vmatpush3.bf16.msra.mxu1 %v3525_v8  ;;  %v1669_v8 = vrot.slane %v1667_v4, 2  ;;  %v3585_v4 = vld [vmem:[%s3850_s8 + $0x8] sm:$0xf8]  }
  0x76   : > { %3204 = vmatpush3.bf16.msra.mxu0 %v3526_v19  ;;  %3105 = vmatprep.subr.bf16.mxu1 %v3529_v20  ;;  %v3559_v19 = vld [vmem:[%s3850_s8 + $0x10] sm:$0xff]  }
  0x77   : > { %3217 = vmatprep.subr.bf16.mxu0 %v3532_v25  ;;  %v1673_v12 = vor.u32 %v1672_v9, %v1669_v8  ;;  %v1903_v22 = vrot.slane %v3559_v19, 3  ;;  %v3587_v9 = vld [vmem:[%s3850_s8 + $0x14] sm:$0xff]  }
  0x78   : > { %3094 = vmatmul.mubr.bf16.vlgmr.msra.gmra.mrb[0].mxu1 %v611_v29  ;;  %v3562_v29 = vld [vmem:[%s3850_s8 + $0x18] sm:$0xff]  }
  0x79   : > { %3106 = vmatpush3.bf16.msra.mxu1 %v3529_v20  ;;  %3206 = vmatmul.mubr.bf16.vlgmr.msra.gmra.mrb[0].mxu0 %v1647_v33  ;;  %v1674_v17 = vsel %vm1621_vm2, %v1664_v59, %v1673_v12  ;;  %v3558_v20 = vld [vmem:[%s3850_s8 + $0x8] sm:$0xf8]   ;;  %v3569_v33 = vld [vmem:[%s3850_s8 + $0x18] sm:$0xff]  }
  0x7a   : > { %3218 = vmatpush3.bf16.msra.mxu0 %v3532_v25  ;;  %3107 = vmatprep.subr.bf16.mxu1 %v3535_v28  ;;  %v1902_v23 = vrot.slane %v3558_v20, 3  ;;  %v3552_v25 = vld [vmem:[#allocation3 + $0x1b0] sm:$0xff]   ;;  %v871_v37 = vrot.slane %v3569_v33, 1  ;;  %v3583_v59 = vld [vmem:[%s3850_s8 + $0x4] sm:$0xfe]  }
  0x7b   : > { %3219 = vmatprep.subr.bf16.mxu0 %v3536_v34  ;;  %3097 = vmatprep.mubr.bf16.mxu1 %v619_v43  ;;  %v3563_v43 = vld [vmem:[#allocation3 + $0xc8] sm:$0xff]   ;;  %v1108_v0 = vshll.u32 %v3583_v59, 16 }
  0x7c   : > { %3209 = vmatprep.mubr.bf16.mxu0 %v1656_v56  ;;  %v1904_v26 = vsel %vm1901_vm4, %v1902_v23, %v1903_v22  ;;  %v874_v55 = vsel %vm865_vm3, %v871_v37, %v873_v47  ;;  %v1911_v56 = vrot.slane %v3911_v51, 3  ;;  %v2151_v23 = vrot.slane %v2149_v16, 3  ;;  %v3594_v47 = vld [vmem:[%s3850_s8 + $0x28] sm:$0xff]  }
  0x7d   : > { %3108 = vmatpush3.bf16.msra.mxu1 %v3535_v28  ;;  %v3561_v28 = vld [vmem:[%s3850_s8 + $0x10] sm:$0xff]   ;;  %v1110_v8 = vrot.slane %v1108_v0, 2 }
  0x7e   : > { %3220 = vmatpush3.bf16.msra.mxu0 %v3536_v34  ;;  %3109 = vmatprep.subr.bf16.mxu1 %v3537_v41  ;;  %v869_v32 = vrot.slane %v3561_v28, 1  ;;  %v1905_v34 = vrot.slane %v3562_v29, 3  ;;  %v1125_v29 = vshll.u32 %v3587_v9, 16 }
  0x7f   : > { %3221 = vmatprep.subr.bf16.mxu0 %v3538_v42 }
  0x80   : > { %3098 = vmatmul.mubr.bf16.gmra.mrb[4].mxu1 %v627_v58  ;;  %v870_v39 = vsel %vm865_vm3, %v867_v18, %v869_v32  ;;  %v872_v46 = vsel %vm865_vm3, %v869_v32, %v871_v37  ;;  %v1908_v49 = vsel %vm1901_vm4, %v1905_v34, %v1907_v40  ;;  %v3588_v18 = vld [vmem:[%s3850_s8 + $0x18] sm:$0xff]   ;;  %v3592_v37 = vld [vmem:[%s3850_s8 + $0x20] sm:$0xff]   ;;  %v1127_v38 = vrot.slane %v1125_v29, 2  ;;  %v3603_v29 = vld [vmem:[%s3850_s8 + $0xc] sm:$0xff]  }
  0x81   : > { %3110 = vmatpush3.bf16.msra.mxu1 %v3537_v41  ;;  %3210 = vmatmul.mubr.bf16.gmra.mrb[4].mxu0 %v1665_v2  ;;  %v3573_v41 = vld [vmem:[%s3850_s8 + $0x28] sm:$0xff]   ;;  %v1113_v2 = vshrl.u32 %v3584_v61, 16  ;;  %v2158_v32 = vshrl.u32 %v3588_v18, 16  ;;  %v2161_v33 = vshll.u32 %v3588_v18, 16 }
  0x82   : > { %3222 = vmatpush3.bf16.msra.mxu0 %v3538_v42  ;;  %3111 = vmatprep.subr.bf16.mxu1 %v3539_v57  ;;  %v1906_v42 = vsel %vm1901_vm4, %v1903_v22, %v1905_v34  ;;  %v1909_v48 = vrot.slane %v3573_v41, 3  ;;  %v3576_v22 = vld [vmem:[#allocation3 + $0x1e8] sm:$0xff]   ;;  %v3591_v34 = vld [vmem:[%s3850_s8 + $0x1c] sm:$0xff]  }
  0x83   : > { %3223 = vmatprep.subr.bf16.mxu0 %v3540_v63  ;;  %3101 = vmatprep.mubr.bf16.mxu1 %v635_v7  ;;  %v1115_v10 = vrot.slane %v1113_v2, 1  ;;  %v3593_v41 = vld [vmem:[%s3850_s8 + $0x24] sm:$0xff]   ;;  %v3597_v61 = vld [vmem:[%s3850_s8 + $0x2c] sm:$0x3f]  }
  0x84   : > { %3213 = vmatprep.mubr.bf16.mxu0 %v1674_v17  ;;  %v1910_v58 = vsel %vm1901_vm4, %v1907_v40, %v1909_v48  ;;  %v1912_v62 = vsel %vm1901_vm4, %v1909_v48, %v1911_v56  ;;  %v2152_v17 = vshll.u32 %v3586_v5, 16  ;;  %v1134_v40 = vshll.u32 %v3591_v34, 16  ;;  %v3582_v48 = vld [vmem:[#allocation3 + $0x1f8] sm:$0xff]  }
  0x85   : > { %3112 = vmatpush3.bf16.msra.mxu1 %v3539_v57  ;;  %v3568_v57 = vld [vmem:[#allocation3 + $0x1d8] sm:$0xff]   ;;  %v1143_v50 = vshll.u32 %v3593_v41, 16  ;;  %v1152_v2 = vshll.u32 %v3597_v61, 16 }
  0x86   : > { %3224 = vmatpush3.bf16.msra.mxu0 %v3540_v63  ;;  %3113 = vmatprep.subr.bf16.mxu1 %v3542_v1  ;;  %v1105_v63 = vshrl.u32 %v3583_v59, 16  ;;  %v2176_v59 = vshrl.u32 %v3594_v47, 16 }
  0x87   : > { %3225 = vmatprep.subr.bf16.mxu0 %v3544_v6 }
  0x88   : > { %3102 = vmatmul.mubr.bf16.gmra.mrb[8].mxu1 %v638_v13  ;;  %v1107_v7 = vrot.slane %v1105_v63, 1  ;;  %v2144_v13 = vshll.u32 %v3585_v4, 16  ;;  %v1145_v63 = vrot.slane %v1143_v50, 2 }
  0x89   : > { %3114 = vmatpush3.bf16.msra.mxu1 %v3542_v1  ;;  %3214 = vmatmul.mubr.bf16.gmra.mrb[8].mxu0 %v1673_v12  ;;  %v3572_v1 = vld [vmem:[#allocation3 + $0xe0] sm:$0xff]   ;;  %v2141_v12 = vshrl.u32 %v3585_v4, 16 }
  0x8a   : > { %3226 = vmatpush3.bf16.msra.mxu0 %v3544_v6  ;;  %3115 = vmatprep.subr.bf16.mxu1 %v3547_v11  ;;  %v3574_v6 = vld [vmem:[#allocation3 + $0x1e0] sm:$0xff]  }
  0x8b   : > { %3227 = vmatprep.subr.bf16.mxu0 %v3548_v15  ;;  %3121 = vmatprep.mubr.bf16.mxu1 %v868_v21  ;;  %v2143_v20 = vrot.slane %v2141_v12, 3  ;;  %v2146_v21 = vrot.slane %v2144_v13, 4  ;;  %v1154_v13 = vrot.slane %v1152_v2, 2 }
  0x8c   : > { %3233 = vmatprep.mubr.bf16.mxu0 %v1904_v26  ;;  %v3579_v26 = vld [vmem:[#allocation3 + $0xf0] sm:$0xff]  }
  0x8d   : > { %3116 = vmatpush3.bf16.msra.mxu1 %v3547_v11  ;;  %v1118_v11 = vrot.slane %v1116_v3, 2  ;;  %v2147_v28 = vor.u32 %v2146_v21, %v2143_v20 }
  0x8e   : > { %3228 = vmatpush3.bf16.msra.mxu0 %v3548_v15  ;;  %3117 = vmatprep.subr.bf16.mxu1 %v3550_v24  ;;  %v1111_v15 = vor.u32 %v1110_v8, %v1107_v7  ;;  %v3590_v8 = vld [vmem:[#allocation3 + $0x208] sm:$0xff]  }
  0x8f   : > { %3229 = vmatprep.subr.bf16.mxu0 %v3552_v25  ;;  %v3925_v19 = vor.u32 %v1118_v11, %v1115_v10 }
  0x91   : > { %3118 = vmatpush3.bf16.msra.mxu1 %v3550_v24  ;;  %v2154_v24 = vrot.slane %v2152_v17, 4 }
  0x92   : > { %3230 = vmatpush3.bf16.msra.mxu0 %v3552_v25  ;;  %3119 = vmatprep.subr.bf16.mxu1 %v3553_v27  ;;  %v1122_v25 = vshrl.u32 %v3587_v9, 16  ;;  %v2178_v9 = vrot.slane %v2176_v59, 3 }
  0x93   : > { %3231 = vmatprep.subr.bf16.mxu0 %v3554_v30 }
  0x95   : > { %3120 = vmatpush3.bf16.msra.mxu1 %v3553_v27  ;;  %v1120_v27 = vsel %vm1103_vm5, %v1111_v15, %v3925_v19 }
  0x96   : > { %3232 = vmatpush3.bf16.msra.mxu0 %v3554_v30  ;;  %3133 = vmatprep.subr.bf16.mxu1 %v3557_v31  ;;  %v3580_v30 = vld [vmem:[#allocation3 + $0x1f0] sm:$0xff]  }
  0x97   : > { %3245 = vmatprep.subr.bf16.mxu0 %v3560_v36 }
  0x98   : > { %3122 = vmatmul.mubr.bf16.vlgmr.msra.gmra.mrb[0].mxu1 %v870_v39  ;;  %v1131_v39 = vshrl.u32 %v3591_v34, 16  ;;  %v3605_v34 = vld [vmem:[%s3850_s8 + $0x14] sm:$0xff]  }
  0x99   : > { %3134 = vmatpush3.bf16.msra.mxu1 %v3557_v31  ;;  %3234 = vmatmul.mubr.bf16.vlgmr.msra.gmra.mrb[0].mxu0 %v1906_v42  ;;  %v2155_v31 = vor.u32 %v2154_v24, %v2151_v23  ;;  %v2167_v42 = vshrl.u32 %v3592_v37, 16  ;;  %v3596_v24 = vld [vmem:[#allocation3 + $0x218] sm:$0xff]  }
  0x9a   : > { %3246 = vmatpush3.bf16.msra.mxu0 %v3560_v36  ;;  %3135 = vmatprep.subr.bf16.mxu1 %v3563_v43  ;;  %v1124_v36 = vrot.slane %v1122_v25, 1  ;;  %v1133_v51 = vrot.slane %v1131_v39, 1 }
  0x9b   : > { %3247 = vmatprep.subr.bf16.mxu0 %v3564_v44  ;;  %3125 = vmatprep.mubr.bf16.mxu1 %v872_v46  ;;  %v2156_v35 = vsel %vm2139_vm6, %v2147_v28, %v2155_v31  ;;  %v2163_v46 = vrot.slane %v2161_v33, 4  ;;  %v3600_v28 = vld [vmem:[#allocation3 + $0x228] sm:$0xff]  }
  0x9c   : > { %3237 = vmatprep.mubr.bf16.mxu0 %v1908_v49  ;;  %v1140_v49 = vshrl.u32 %v3593_v41, 16  ;;  %v3606_v33 = vld [vmem:[%s3850_s8 + $0x24] sm:$0xff]  }
  0x9d   : > { %3136 = vmatpush3.bf16.msra.mxu1 %v3563_v43  ;;  %v2170_v43 = vshll.u32 %v3592_v37, 16 }
  0x9e   : > { %3248 = vmatpush3.bf16.msra.mxu0 %v3564_v44  ;;  %3137 = vmatprep.subr.bf16.mxu1 %v3565_v45  ;;  %v3581_v44 = vld [vmem:[#allocation3 + $0xf8] sm:$0xff]  }
  0x9f   : > { %3249 = vmatprep.subr.bf16.mxu0 %v3566_v52 }
  0xa0   : > { %3126 = vmatmul.mubr.bf16.gmra.mrb[4].mxu1 %v874_v55  ;;  %v2169_v55 = vrot.slane %v2167_v42, 3 }
  0xa1   : > { %3138 = vmatpush3.bf16.msra.mxu1 %v3565_v45  ;;  %3238 = vmatmul.mubr.bf16.gmra.mrb[4].mxu0 %v1910_v58  ;;  %v2160_v45 = vrot.slane %v2158_v32, 3  ;;  %v3602_v32 = vld [vmem:[#allocation3 + $0x238] sm:$0xff]  }
  0xa2   : > { %3250 = vmatpush3.bf16.msra.mxu0 %v3566_v52  ;;  %3139 = vmatprep.subr.bf16.mxu1 %v3567_v54  ;;  %v1136_v52 = vrot.slane %v1134_v40, 2 }
  0xa3   : > { %3251 = vmatprep.subr.bf16.mxu0 %v3568_v57  ;;  %3129 = vmatprep.mubr.bf16.mxu1 %v876_v60  ;;  %v2164_v58 = vor.u32 %v2163_v46, %v2160_v45  ;;  %v2179_v60 = vshll.u32 %v3594_v47, 16 }
  0xa4   : > { %3241 = vmatprep.mubr.bf16.mxu0 %v1912_v62  ;;  %v1142_v62 = vrot.slane %v1140_v49, 1  ;;  %v1137_v0 = vor.u32 %v1136_v52, %v1133_v51 }
  0xa5   : > { %3140 = vmatpush3.bf16.msra.mxu1 %v3567_v54  ;;  %v3589_v54 = vld [vmem:[#allocation3 + $0x200] sm:$0xff]   ;;  %v2165_v7 = vsel %vm2139_vm6, %v2155_v31, %v2164_v58  ;;  %v2181_v10 = vrot.slane %v2179_v60, 4  ;;  %v3601_v31 = vld [vmem:[#allocation3 + $0x230] sm:$0xff]  }
  0xa6   : > { %3252 = vmatpush3.bf16.msra.mxu0 %v3568_v57  ;;  %3141 = vmatprep.subr.bf16.mxu1 %v3572_v1  ;;  %v3598_v57 = vld [vmem:[%s3850_s8 + $0x30] sm:$0xff]   ;;  %v1146_v15 = vor.u32 %v1145_v63, %v1142_v62 }
  0xa7   : > { %3253 = vmatprep.subr.bf16.mxu0 %v3574_v6  ;;  %v2185_v5 = vshrl.u32 %v3598_v57, 16  ;;  %v2182_v18 = vor.u32 %v2181_v10, %v2178_v9 }
  0xa8   : > { %3130 = vmatmul.mubr.bf16.gmra.mrb[8].mxu1 %v875_v53  ;;  %v1128_v53 = vor.u32 %v1127_v38, %v1124_v36  ;;  %v1147_v21 = vsel %vm1103_vm5, %v1137_v0, %v1146_v15  ;;  %v3608_v36 = vld [vmem:[%s3850_s8 + $0x34] ss:$0 sps:$4 sm:$0xff]  }
  0xa9   : > { %3142 = vmatpush3.bf16.msra.mxu1 %v3572_v1  ;;  %3242 = vmatmul.mubr.bf16.gmra.mrb[8].mxu0 %v1911_v56  ;;  %v2172_v56 = vrot.slane %v2170_v43, 4  ;;  %v1149_v1 = vshrl.u32 %v3597_v61, 16  ;;  %v2187_v16 = vrot.slane %v2185_v5, 3 }
  0xaa   : > { %3254 = vmatpush3.bf16.msra.mxu0 %v3574_v6  ;;  %3143 = vmatprep.subr.bf16.mxu1 %v3575_v14  ;;  %v1129_v3 = vsel %vm1103_vm5, %v3925_v19, %v1128_v53  ;;  %v2188_v6 = vshll.u32 %v3598_v57, 16  ;;  %v1138_v11 = vsel %vm1103_vm5, %v1128_v53, %v1137_v0  ;;  %v3595_v19 = vld [vmem:[#allocation3 + $0x210] sm:$0xff]   ;;  %v3955_v0 = vld [vmem:[%s4048_s2] ss:$0 sm:$0xff] }
  0xab   : > { %3255 = vmatprep.subr.bf16.mxu0 %v3576_v22  ;;  %3149 = vmatprep.mubr.bf16.mxu1 %v1120_v27  ;;  %v2173_v4 = vor.u32 %v2172_v56, %v2169_v55  ;;  %v1151_v12 = vrot.slane %v1149_v1, 1  ;;  %v3599_v27 = vld [vmem:[#allocation3 + $0x220] sm:$0xff]  }
  0xac   : > { %3261 = vmatprep.mubr.bf16.mxu0 %v2156_v35  ;;  %v2190_v17 = vrot.slane %v2188_v6, 4  ;;  %v3607_v35 = vld [vmem:[%s3850_s8 + $0x2c] sm:$0xff]   ;;  %v2918_v6 = vld [vmem:[%s4049_s3] ss:$0 sm:$0xff] }
  0xad   : > { %3144 = vmatpush3.bf16.msra.mxu1 %v3575_v14  ;;  %v2174_v14 = vsel %vm2139_vm6, %v2164_v58, %v2173_v4  ;;  %v1155_v20 = vor.u32 %v1154_v13, %v1151_v12  ;;  %v2183_v23 = vsel %vm2139_vm6, %v2173_v4, %v2182_v18 }
  0xae   : > { %3256 = vmatpush3.bf16.msra.mxu0 %v3576_v22  ;;  %3145 = vmatprep.subr.bf16.mxu1 %v3579_v26  ;;  %v2191_v22 = vor.u32 %v2190_v17, %v2187_v16 }
  0xaf   : > { %3257 = vmatprep.subr.bf16.mxu0 %v3580_v30  ;;  %v1156_v25 = vsel %vm1103_vm5, %v1146_v15, %v1155_v20 }
  0xb1   : > { %3146 = vmatpush3.bf16.msra.mxu1 %v3579_v26  ;;  %v2192_v26 = vsel %vm2139_vm6, %v2182_v18, %v2191_v22 }
  0xb2   : > { %3258 = vmatpush3.bf16.msra.mxu0 %v3580_v30  ;;  %3147 = vmatprep.subr.bf16.mxu1 %v3581_v44  ;;  %v3604_v30 = vld [vmem:[%s3850_s8 + $0x1c] sm:$0xff]   ;;  %s3643_s8 = scalar_lea.vmem %s3642_s7, 2816 }
  0xb3   : > { %3259 = vmatprep.subr.bf16.mxu0 %v3582_v48  ;;  %p3645_p3 = scmp.lt.s32.totalorder %s3643_s8, %s3637_s30 }
  0xb5   : > { %3148 = vmatpush3.bf16.msra.mxu1 %v3581_v44  ;;  %p3646_p5 = por %p3645_p3, %p3644_p1 }
  0xb6   : > { %3260 = vmatpush3.bf16.msra.mxu0 %v3582_v48  ;;  %3301 = vmatprep.subr.bf16.mxu1 %v3589_v54 }
  0xb7   : > { %3273 = vmatprep.subr.bf16.mxu0 %v3589_v54  ;;  %p3647_p6 = pnand %p3646_p5, %p3640_p13 }
  0xb8   : > { %3150 = vmatmul.mubr.bf16.vlgmr.msra.gmra.mrb[0].mxu1 %v1129_v3 }
  0xb9   : > { %3262 = vmatmul.mubr.bf16.vlgmr.msra.gmra.mrb[0].mxu0 %v2165_v7  ;;  %3309 = vmatpush3.bf16.msra.mxu1 %v3589_v54 }
  0xba   : > { %3274 = vmatpush3.bf16.msra.mxu0 %v3589_v54  ;;  %3302 = vmatprep.subr.bf16.mxu1 %v3590_v8 }
  0xbb   : > { %3275 = vmatprep.subr.bf16.mxu0 %v3590_v8  ;;  %3153 = vmatprep.mubr.bf16.mxu1 %v1138_v11 }
  0xbc   : > { %3265 = vmatprep.mubr.bf16.mxu0 %v2174_v14 }
  0xbd   : > { %3310 = vmatpush3.bf16.msra.mxu1 %v3590_v8 }
  0xbe   : > { %3276 = vmatpush3.bf16.msra.mxu0 %v3590_v8  ;;  %3303 = vmatprep.subr.bf16.mxu1 %v3595_v19 }
  0xbf   : > { %3277 = vmatprep.subr.bf16.mxu0 %v3595_v19 }
  0xc0   : > { %3154 = vmatmul.mubr.bf16.gmra.mrb[4].mxu1 %v1147_v21 }
  0xc1   : > { %3266 = vmatmul.mubr.bf16.gmra.mrb[4].mxu0 %v2183_v23  ;;  %3311 = vmatpush3.bf16.msra.mxu1 %v3595_v19 }
  0xc2   : > { %3278 = vmatpush3.bf16.msra.mxu0 %v3595_v19  ;;  %3304 = vmatprep.subr.bf16.mxu1 %v3596_v24 }
  0xc3   : > { %3279 = vmatprep.subr.bf16.mxu0 %v3596_v24  ;;  %3157 = vmatprep.mubr.bf16.mxu1 %v1156_v25 }
  0xc4   : > { %3269 = vmatprep.mubr.bf16.mxu0 %v2192_v26 }
  0xc5   : > { %3312 = vmatpush3.bf16.msra.mxu1 %v3596_v24 }
  0xc6   : > { %3280 = vmatpush3.bf16.msra.mxu0 %v3596_v24  ;;  %3305 = vmatprep.subr.bf16.mxu1 %v3599_v27 }
  0xc7   : > { %3281 = vmatprep.subr.bf16.mxu0 %v3599_v27 }
  0xc8   : > { %3158 = vmatmul.mubr.bf16.gmra.mrb[8].mxu1 %v1155_v20 }
  0xc9   : > { %3270 = vmatmul.mubr.bf16.gmra.mrb[8].mxu0 %v2191_v22  ;;  %3313 = vmatpush3.bf16.msra.mxu1 %v3599_v27 }
  0xca   : > { %3282 = vmatpush3.bf16.msra.mxu0 %v3599_v27  ;;  %3306 = vmatprep.subr.bf16.mxu1 %v3600_v28 }
  0xcb   : > { %3283 = vmatprep.subr.bf16.mxu0 %v3600_v28  ;;  %3289 = vmatprep.mubr.bf16.mxu0 %v3603_v29 }
  0xcc   : > { %3293 = vmatprep.mubr.bf16.mxu1 %v3604_v30 }
  0xcd   : > { %3314 = vmatpush3.bf16.msra.mxu1 %v3600_v28 }
  0xce   : > { %3284 = vmatpush3.bf16.msra.mxu0 %v3600_v28  ;;  %3307 = vmatprep.subr.bf16.mxu1 %v3601_v31 }
  0xcf   : > { %3285 = vmatprep.subr.bf16.mxu0 %v3601_v31 }
  0xd1   : > { %3315 = vmatpush3.bf16.msra.mxu1 %v3601_v31 }
  0xd2   : > { %3286 = vmatpush3.bf16.msra.mxu0 %v3601_v31  ;;  %3308 = vmatprep.subr.bf16.mxu1 %v3602_v32 }
  0xd3   : > { %3287 = vmatprep.subr.bf16.mxu0 %v3602_v32 }
  0xd5   : > { %3316 = vmatpush3.bf16.msra.mxu1 %v3602_v32 }
  0xd6   : > { %3288 = vmatpush3.bf16.msra.mxu0 %v3602_v32 }
  0xd8   : > { %3294 = vmatmul.mubr.bf16.vlgmr.msra.gmra.mrb[12].mxu1 %v3606_v33 }
  0xd9   : > { %3290 = vmatmul.mubr.bf16.vlgmr.msra.gmra.mrb[0].mxu0 %v3605_v34  ;;  %3297 = vmatprep.mubr.bf16.mxu1 %v3607_v35 }
  0xe0   : > { %3298 = vmatmul.mubr.bf16.gmra.mrb[16].mxu1 %v3608_v36 }
 0x18b   : > { %v3151_v37 = vpop.f32.mrb[0].mxu1 }
 0x18c   : > { %v1245_v38 = vpop.f32.mrb[1].mxu1 }
 0x18d   : > { %v3152_v39 = vpop.f32.mrb[2].mxu1 }
 0x18e   : > { %v1248_v40 = vpop.f32.mrb[3].mxu1 }
 0x193   : > { %v3155_v41 = vpop.f32.mrb[4].mxu1 }
 0x194   : > { %v3267_v42 = vpop.f32.mrb[4].mxu0  ;;  %v1261_v43 = vpop.f32.mrb[5].mxu1 }
 0x195   : > { %v3321_v44 = vadd.f32 %v3267_v42, %v3155_v41  ;;  %v2297_v45 = vpop.f32.mrb[5].mxu0  ;;  %v3156_v46 = vpop.f32.mrb[6].mxu1 }
 0x196   : > { %v3323_v47 = vadd.f32 %v2297_v45, %v1261_v43  ;;  %v3268_v48 = vpop.f32.mrb[6].mxu0  ;;  %v1264_v49 = vpop.f32.mrb[7].mxu1 }
 0x197   : > { %v3325_v50 = vadd.f32 %v3268_v48, %v3156_v46  ;;  %v2300_v51 = vpop.f32.mrb[7].mxu0 }
 0x198   : > { %v3327_v52 = vadd.f32 %v2300_v51, %v1264_v49 }
 0x19b   : > { %v3159_v53 = vpop.f32.mrb[8].mxu1 }
 0x19c   : > { %v3271_v54 = vpop.f32.mrb[8].mxu0  ;;  %v1277_v55 = vpop.f32.mrb[9].mxu1 }
 0x19d   : > { %v3329_v56 = vadd.f32 %v3271_v54, %v3159_v53  ;;  %v2313_v57 = vpop.f32.mrb[9].mxu0  ;;  %v3160_v58 = vpop.f32.mrb[10].mxu1 }
 0x19e   : > { %v3331_v59 = vadd.f32 %v2313_v57, %v1277_v55  ;;  %v3272_v60 = vpop.f32.mrb[10].mxu0  ;;  %v1280_v61 = vpop.f32.mrb[11].mxu1 }
 0x19f   : > { %v2316_v62 = vpop.f32.mrb[11].mxu0 }
 0x1a0   : > { %v3333_v63 = vadd.f32 %v2316_v62, %v1280_v61 }
 0x1ab   : > { %v3295_v1 = vpop.f32.mrb[12].mxu1 }
 0x1ac   : > { %v3291_v2 = vpop.f32.mrb[0].mxu0  ;;  %v3322_v3 = vadd.f32 %v3321_v44, %v3295_v1  ;;  %v2520_v4 = vpop.f32.mrb[13].mxu1 }
 0x1ad   : > { %v3317_v5 = vadd.f32 %v3291_v2, %v3151_v37  ;;  %v2504_v7 = vpop.f32.mrb[1].mxu0  ;;  %v3324_v8 = vadd.f32 %v3323_v47, %v2520_v4  ;;  %v3296_v9 = vpop.f32.mrb[14].mxu1 }
 0x1ae   : > { %v2599_v10 = vmul.f32 %v3322_v3, %v3955_v0  ;;  %v3318_v11 = vadd.f32 %v2504_v7, %v1245_v38  ;;  %v3292_v12 = vpop.f32.mrb[2].mxu0  ;;  %v3326_v13 = vadd.f32 %v3325_v50, %v3296_v9  ;;  %v2523_v14 = vpop.f32.mrb[15].mxu1 }
 0x1af   : > { %v2595_v15 = vmul.f32 %v3317_v5, %v3955_v0  ;;  %v2597_v16 = vmul.f32 %v3324_v8, %v3955_v0  ;;  %v3319_v17 = vadd.f32 %v3292_v12, %v3152_v39  ;;  %v2507_v18 = vpop.f32.mrb[3].mxu0  ;;  %v3328_v19 = vadd.f32 %v3327_v52, %v2523_v14 }
 0x1b0   : > { %v2617_v20 = vadd.f32 %v2918_v6, %v2599_v10  ;;  %v2593_v21 = vmul.f32 %v3318_v11, %v3955_v0  ;;  %v2600_v22 = vmul.f32 %v3326_v13, %v3955_v0  ;;  %v3320_v23 = vadd.f32 %v2507_v18, %v1248_v40 }
 0x1b1   : > { %v2613_v24 = vadd.f32 %v2918_v6, %v2595_v15  ;;  %v2615_v25 = vadd.f32 %v2918_v6, %v2597_v16  ;;  %v2596_v26 = vmul.f32 %v3319_v17, %v3955_v0  ;;  %v2598_v27 = vmul.f32 %v3328_v19, %v3955_v0 }
 0x1b2   : > { %v2628_v28 = vmax.f32 %v2617_v20, 0.0  ;;  %v2611_v29 = vadd.f32 %v2918_v6, %v2593_v21  ;;  %v2618_v30 = vadd.f32 %v2918_v6, %v2600_v22  ;;  %v2594_v31 = vmul.f32 %v3320_v23, %v3955_v0 }
 0x1b3   : > { %v2624_v32 = vmax.f32 %v2613_v24, 0.0  ;;  %v2626_v33 = vmax.f32 %v2615_v25, 0.0  ;;  %v2614_v34 = vadd.f32 %v2918_v6, %v2596_v26  ;;  %v2616_v35 = vadd.f32 %v2918_v6, %v2598_v27  ;;  %v3299_v36 = vpop.f32.mrb[16].mxu1 }
 0x1b4   : > { %2639 = vst [vmem:[%s3973_s21 + $0x30] sm:$0xff] %v2628_v28  ;;  %v2622_v37 = vmax.f32 %v2611_v29, 0.0  ;;  %v2629_v38 = vmax.f32 %v2618_v30, 0.0  ;;  %v2612_v39 = vadd.f32 %v2918_v6, %v2594_v31  ;;  %v3330_v40 = vadd.f32 %v3329_v56, %v3299_v36  ;;  %v2536_v41 = vpop.f32.mrb[17].mxu1 }
 0x1b5   : > { %2635 = vst [vmem:[%s3973_s21 + $0x10] sm:$0xff] %v2624_v32  ;;  %2637 = vst [vmem:[%s3973_s21 + $0x20] sm:$0xff] %v2626_v33  ;;  %v2625_v42 = vmax.f32 %v2614_v34, 0.0  ;;  %v2627_v43 = vmax.f32 %v2616_v35, 0.0  ;;  %v3332_v44 = vadd.f32 %v3331_v59, %v2536_v41  ;;  %v3300_v45 = vpop.f32.mrb[18].mxu1 }
 0x1b6   : > { %2633 = vst [vmem:[%s3973_s21] sm:$0xff] %v2622_v37  ;;  %2640 = vst [vmem:[%s3973_s21 + $0x38] sm:$0xff] %v2629_v38  ;;  %v2623_v46 = vmax.f32 %v2612_v39, 0.0  ;;  %v2603_v47 = vmul.f32 %v3330_v40, %v3955_v0  ;;  %v2539_v48 = vpop.f32.mrb[19].mxu1 }
 0x1b7   : > { %2636 = vst [vmem:[%s3973_s21 + $0x18] sm:$0xff] %v2625_v42  ;;  %2638 = vst [vmem:[%s3973_s21 + $0x28] sm:$0xff] %v2627_v43  ;;  %v2601_v49 = vmul.f32 %v3332_v44, %v3955_v0  ;;  %v3334_v50 = vadd.f32 %v3333_v63, %v2539_v48 }
 0x1b8   : > { %2634 = vst [vmem:[%s3973_s21 + $0x8] sm:$0xff] %v2623_v46  ;;  %v2621_v51 = vadd.f32 %v2918_v6, %v2603_v47 }
 0x1b9   : > { %v2619_v52 = vadd.f32 %v2918_v6, %v2601_v49  ;;  %v2602_v53 = vmul.f32 %v3334_v50, %v3955_v0 }
 0x1ba   : > { %v2632_v54 = vmax.f32 %v2621_v51, 0.0 }
 0x1bb   : > { %v2630_v55 = vmax.f32 %v2619_v52, 0.0  ;;  %v2620_v56 = vadd.f32 %v2918_v6, %v2602_v53 }
 0x1bc   : > { %2643 = vst [vmem:[%s3973_s21 + $0x50] sm:$0xff] %v2632_v54 }
 0x1bd   : > { %2641 = vst [vmem:[%s3973_s21 + $0x40] sm:$0xff] %v2630_v55  ;;  %v2631_v57 = vmax.f32 %v2620_v56, 0.0 }
 0x1bf   : > { %2642 = vst [vmem:[%s3973_s21 + $0x48] sm:$0xff] %v2631_v57 }
 0x1c0   : > { %3650 = shalt.err (!%p3647_p6)
}
 0x1c1   : > { %s3651_s9 = scalar_lea.hbm %s3992_s29, 1408  ;;  %s3655_s12 = scalar_lea.hbm %s4050_s4, 2816 }
 0x1c2   : > { %p3652_p7 = scmp.ne.s32.totalorder %s3992_s29, %s3651_s9  ;;  %p3656_p0 = scmp.lt.u32.totalorder %s3992_s29, %s4050_s4 }
 0x1c3   : > { %p3657_p2 = scmp.lt.u32.totalorder %s3655_s12, %s3651_s9  ;;  %p3659_p8 = scmp.lt.u32.totalorder %s3651_s9, %s3992_s29 }
 0x1c4   : > { %p3653_p9 = pnand %p3652_p7, %p4062_p10 }
 0x1c5   : > { %p3658_p4 = por %p3657_p2, %p3656_p0 }
 0x1c6   : > { %p3654_p12 = pneg %p3653_p9 }
 0x1c7   : > { %p3660_p11 = por %p3659_p8, %p3658_p4 }
 0x1c9   : > { %p3661_p13 = pnand %p3660_p11, %p3654_p12 }
 0x1cb   : > { %3664 = shalt.err (!%p3661_p13)
}
 0x1cc   : > { %s3725_s21 = smov 128   ;;  %s3726_s22 = smov 8  }
 0x1cd   : > { %3417 = dma.vmem_to_hbm [thread:$0]  (%p4062_p10), %s3995_s24, 1408, %s3992_s29, %s4000_s18, %s3725_s21, %s3725_s21, %s3726_s22  }
 0x1ce PF: > { %p3429_p1 = scmp.ge.s32.totalorder %s3719_s20, 2  ;;  %s2674_s26 = sand.u32 1, %s3699_s15  }
 0x1cf   : > { %p4063_p3 = scmp.ne.s32.totalorder %s4056_s27, 0  ;;  %s2675_s5 = scalar_lea.sflag [#allocation5], %s2674_s26 }
 0x1d1   : > { %p3424_p5 = pnand %p3429_p1, %p4063_p3 }
 0x1d3   : > { %3694 = dma.done.wait (!%p3424_p5), %s2675_s5, 1408  }
 0x1d4   : > { %3696 = vsyncadd (!%p3424_p5), %s2675_s5, 4294965888  ;;  %s18_s20 = sadd.s32 1, %s3719_s20   ;;  %s4064_s15 = smov %s3703_s16 }
 0x1d5   : > { %p15_p6 = scmp.ge.s32.totalorder %s18_s20, 4   ;;  %s4065_s16 = smov %s3707_s17 }
 0x1d6   : > { %s4066_s17 = smov %s3805_s28  ;;  %s4067_s18 = smov %s3715_s19 }
 0x1d7   : > { %s4068_s19 = smov %s4070_s23  ;;  %17 = sbr.rel (!%p15_p6) target bundleno = 5 (0x5), region = 99 }
 0x1de   :  { %2680 = vsyncpa [#allocation4], 1 }
 0x1df   :  { %2682 = vsyncpa [#allocation4 + $0x1], 1 }
 0x1e0   :  { %2683 = vsyncpa [#allocation5], 1 }
 0x1e1   :  { %2685 = vsyncpa [#allocation5 + $0x1], 1 }

</bundles_post_ra>
